<compile_context>
chip_gen: v5e
topology: v5e:2x2
jax: 0.10.0
libtpu: 0.0.40
codegen_flags: <defaults>
</compile_context>

<pallas_src>
import functools
import math

import jax
import jax.numpy as jnp
from jax import lax
from jax.experimental import pallas as pl
from jax.experimental.pallas import tpu as pltpu

_NEG_INF = -1e30
_VMEM_LIMIT = 48 * 1024 * 1024   # below per-core VMEM of every generation (v7x: 64 MiB)


def _fit_tile(dim, target, granularity):
    """Largest tile <= target that divides `dim` and respects TPU tiling rules.

    Falls back to the full dimension (always legal via the full-dim exception)
    if no aligned divisor is found.
    """
    t = min(dim, target)
    if t == dim:
        return dim
    while t >= granularity and dim % t != 0:
        t //= 2
    if t >= granularity and dim % t == 0:
        return t
    return dim


# ----------------------------- tiled linear kernel --------------------------------
def _linear_kernel(x_ref, w_ref, b_ref, o_ref, acc_ref):
    # x: (tm, tk), w: (tk, tn), b: (1, tn), o: (tm, tn), acc: (tm, tn) f32
    k = pl.program_id(2)

    @pl.when(k == 0)
    def _init():
        acc_ref[...] = jnp.zeros_like(acc_ref)

    acc_ref[...] += jnp.dot(x_ref[...], w_ref[...],
                            preferred_element_type=jnp.float32)

    @pl.when(k == pl.num_programs(2) - 1)
    def _finalize():
        o_ref[...] = (acc_ref[...] + b_ref[...].astype(jnp.float32)).astype(o_ref.dtype)


def pallas_linear(x2d, w, b, *, tm=256, tn=256, tk=512):
    """x2d: (M, K) @ w: (K, N) + b: (N,) -> (M, N), tiled for the MXU."""
    M, K = x2d.shape
    N = w.shape[1]
    tm = _fit_tile(M, tm, 8)     # sublane axis
    tn = _fit_tile(N, tn, 128)   # lane axis
    tk = _fit_tile(K, tk, 128)   # lane axis of x / sublane axis of w
    grid = (M // tm, N // tn, K // tk)
    return pl.pallas_call(
        _linear_kernel,
        out_shape=jax.ShapeDtypeStruct((M, N), x2d.dtype),
        grid_spec=pltpu.PrefetchScalarGridSpec(
            num_scalar_prefetch=0,
            grid=grid,
            in_specs=[
                pl.BlockSpec((tm, tk), lambda i, j, k: (i, k)),
                pl.BlockSpec((tk, tn), lambda i, j, k: (k, j)),
                pl.BlockSpec((1, tn), lambda i, j, k: (0, j)),
            ],
            out_specs=pl.BlockSpec((tm, tn), lambda i, j, k: (i, j)),
            scratch_shapes=[pltpu.VMEM((tm, tn), jnp.float32)],
        ),
        compiler_params=pltpu.CompilerParams(
            dimension_semantics=("parallel", "parallel", "arbitrary"),
            vmem_limit_bytes=_VMEM_LIMIT),
    )(x2d, w, b.reshape(1, N))


# --------------------------- flash attention kernel --------------------------------
def _flash_attn_kernel(q_ref, k_ref, v_ref, o_ref, m_sc, l_sc, acc_sc, *, sm_scale):
    # Block shapes (per head): q/out (tq, hd), k/v (tk, hd); scratch m/l (tq, 1), acc (tq, hd).
    qi = pl.program_id(2)
    ki = pl.program_id(3)
    tq = q_ref.shape[0]
    tk = k_ref.shape[0]

    @pl.when(ki == 0)
    def _init():
        m_sc[...] = jnp.full_like(m_sc, _NEG_INF)
        l_sc[...] = jnp.zeros_like(l_sc)
        acc_sc[...] = jnp.zeros_like(acc_sc)

    q_start = qi * tq
    kv_start = ki * tk

    def _block(apply_mask):
        # Fold the 1/sqrt(hd) scale into q (cheaper than scaling the (tq, tk) scores).
        q = q_ref[...] * sm_scale
        # (tq, hd) x (tk, hd) contracted on hd -> (tq, tk) on the MXU, f32 accumulate.
        s = lax.dot_general(q, k_ref[...], (((1,), (1,)), ((), ())),
                            preferred_element_type=jnp.float32)
        if apply_mask:  # only diagonal blocks pay for the iota mask
            row = lax.broadcasted_iota(jnp.int32, s.shape, 0) + q_start
            col = lax.broadcasted_iota(jnp.int32, s.shape, 1) + kv_start
            s = jnp.where(col <= row, s, _NEG_INF)
        m_prev = m_sc[...]
        m_new = jnp.maximum(m_prev, jnp.max(s, axis=-1, keepdims=True))
        alpha = jnp.exp(m_prev - m_new)
        p = jnp.exp(s - m_new)
        l_sc[...] = alpha * l_sc[...] + jnp.sum(p, axis=-1, keepdims=True)
        acc_sc[...] = alpha * acc_sc[...] + jnp.dot(
            p.astype(v_ref.dtype), v_ref[...], preferred_element_type=jnp.float32)
        m_sc[...] = m_new

    last_q_row = q_start + tq - 1
    last_kv_col = kv_start + tk - 1

    # Entirely below the causal boundary: no mask needed.
    @pl.when(last_kv_col <= q_start)
    def _full_block():
        _block(apply_mask=False)

    # Straddles the causal boundary: apply the mask.
    @pl.when(jnp.logical_and(last_kv_col > q_start, kv_start <= last_q_row))
    def _diag_block():
        _block(apply_mask=True)

    # Fully-masked kv blocks: compute is skipped here AND their k/v DMAs are elided by
    # the clamped index_map in the wrappers (block index repeats -> no refetch).

    @pl.when(ki == pl.num_programs(3) - 1)
    def _finalize():
        inv_l = pl.reciprocal(l_sc[...], approx=True)   # EUP: off the VPU critical path
        o_ref[...] = (acc_sc[...] * inv_l).astype(o_ref.dtype)


def _attn_scratch(tq, hd):
    return [
        pltpu.VMEM((tq, 1), jnp.float32),    # running max  m
        pltpu.VMEM((tq, 1), jnp.float32),    # running sum  l
        pltpu.VMEM((tq, hd), jnp.float32),   # running acc
    ]


def pallas_attention_from_qkv(qkv, n_head, *, tq=128, tk=128):
    """qkv: (B, T, 3C) from c_attn -> y: (B, T, C), causal flash attention.

    Head blocks are sliced directly out of the lane dimension by BlockSpec index maps
    and the output is written back already merged (lane-dense), so no XLA transposes
    or head-split copies touch HBM.  Requires head_dim % 128 == 0.
    """
    B, T, C3 = qkv.shape
    C = C3 // 3
    H = n_head
    hd = C // H
    assert hd % 128 == 0
    tq = _fit_tile(T, tq, 8)
    tk = _fit_tile(T, tk, 8)
    grid = (B, H, T // tq, T // tk)

    def kv_block(ki, qi):
        # Last kv block intersecting the causal region for this q block.  Beyond it we
        # keep returning the same index so Pallas elides the (useless) k/v DMAs.
        kmax = ((qi + 1) * tq - 1) // tk
        return jnp.minimum(ki, kmax)

    in_specs = [
        pl.BlockSpec((None, tq, hd), lambda b, h, qi, ki: (b, qi, h)),
        pl.BlockSpec((None, tk, hd), lambda b, h, qi, ki: (b, kv_block(ki, qi), H + h)),
        pl.BlockSpec((None, tk, hd), lambda b, h, qi, ki: (b, kv_block(ki, qi), 2 * H + h)),
    ]
    out_specs = pl.BlockSpec((None, tq, hd), lambda b, h, qi, ki: (b, qi, h))
    kernel = functools.partial(_flash_attn_kernel, sm_scale=1.0 / math.sqrt(hd))
    return pl.pallas_call(
        kernel,
        out_shape=jax.ShapeDtypeStruct((B, T, C), qkv.dtype),
        grid_spec=pltpu.PrefetchScalarGridSpec(
            num_scalar_prefetch=0,
            grid=grid,
            in_specs=in_specs,
            out_specs=out_specs,
            scratch_shapes=_attn_scratch(tq, hd),
        ),
        compiler_params=pltpu.CompilerParams(
            dimension_semantics=("parallel", "parallel", "parallel", "arbitrary"),
            vmem_limit_bytes=_VMEM_LIMIT),
    )(qkv, qkv, qkv)


def pallas_attention_heads(q, k, v, *, tq=128, tk=128):
    """q, k, v: (B, H, T, hd) -> (B, H, T, hd) causal flash attention (any head_dim)."""
    B, H, T, hd = q.shape
    tq = _fit_tile(T, tq, 8)
    tk = _fit_tile(T, tk, 8)
    grid = (B, H, T // tq, T // tk)

    def kv_block(ki, qi):
        kmax = ((qi + 1) * tq - 1) // tk
        return jnp.minimum(ki, kmax)

    q_spec = pl.BlockSpec((None, None, tq, hd), lambda b, h, qi, ki: (b, h, qi, 0))
    kv_spec = pl.BlockSpec((None, None, tk, hd),
                           lambda b, h, qi, ki: (b, h, kv_block(ki, qi), 0))
    kernel = functools.partial(_flash_attn_kernel, sm_scale=1.0 / math.sqrt(hd))
    return pl.pallas_call(
        kernel,
        out_shape=jax.ShapeDtypeStruct((B, H, T, hd), q.dtype),
        grid_spec=pltpu.PrefetchScalarGridSpec(
            num_scalar_prefetch=0,
            grid=grid,
            in_specs=[q_spec, kv_spec, kv_spec],
            out_specs=q_spec,
            scratch_shapes=_attn_scratch(tq, hd),
        ),
        compiler_params=pltpu.CompilerParams(
            dimension_semantics=("parallel", "parallel", "parallel", "arbitrary"),
            vmem_limit_bytes=_VMEM_LIMIT),
    )(q, k, v)


# --------------------------- full module forward ------------------------------
def causal_self_attention(x, params, n_head, *, attn_tq=128, attn_tk=128):
    """Forward pass equivalent to the PyTorch CausalSelfAttention module."""
    B, T, C = x.shape
    hd = C // n_head

    # qkv = self.c_attn(x)
    qkv = pallas_linear(x.reshape(B * T, C), params["w_attn"], params["b_attn"])
    qkv = qkv.reshape(B, T, 3 * C)

    if hd % 128 == 0:
        # Fast path: heads read straight out of (B, T, 3C) and written back merged
        # as (B, T, C) inside the kernel -> zero transposes / head-split HBM traffic.
        y = pallas_attention_from_qkv(qkv, n_head, tq=attn_tq, tk=attn_tk)
        y = y.reshape(B * T, C)
    else:
        # TODO(synk): head_dim not lane-aligned (e.g. 64) -> fall back to XLA head
        # split/merge transposes around the same kernel; an in-kernel relayout could
        # remove these too.
        q, k, v = jnp.split(qkv, 3, axis=2)
        q = q.reshape(B, T, n_head, hd).transpose(0, 2, 1, 3)
        k = k.reshape(B, T, n_head, hd).transpose(0, 2, 1, 3)
        v = v.reshape(B, T, n_head, hd).transpose(0, 2, 1, 3)
        y = pallas_attention_heads(q, k, v, tq=attn_tq, tk=attn_tk)
        y = y.transpose(0, 2, 1, 3).reshape(B * T, C)

    # y = self.c_proj(y)
    y = pallas_linear(y, params["w_proj"], params["b_proj"])
    return y.reshape(B, T, C)


# ------------------------------ reference ------------------------------------
def reference_attention(x, params, n_head):
    B, T, C = x.shape
    hd = C // n_head
    qkv = x.reshape(B * T, C) @ params["w_attn"] + params["b_attn"]
    qkv = qkv.reshape(B, T, 3 * C)
    q, k, v = jnp.split(qkv, 3, axis=2)
    q = q.reshape(B, T, n_head, hd).transpose(0, 2, 1, 3)
    k = k.reshape(B, T, n_head, hd).transpose(0, 2, 1, 3)
    v = v.reshape(B, T, n_head, hd).transpose(0, 2, 1, 3)
    s = jnp.einsum("bhqd,bhkd->bhqk", q, k) / math.sqrt(hd)
    mask = jnp.tril(jnp.ones((T, T), dtype=bool))
    s = jnp.where(mask, s, -1e30)
    p = jax.nn.softmax(s, axis=-1)
    y = jnp.einsum("bhqk,bhkd->bhqd", p, v)
    y = y.transpose(0, 2, 1, 3).reshape(B * T, C)
    y = y @ params["w_proj"] + params["b_proj"]
    return y.reshape(B, T, C)


# -------------------------------- main ----------------------------------------
if __name__ == "__main__":
    # Small, but big enough to exercise every tiled path:
    #   c_attn grid (2, 6, 1), attention grid (2, H, 2, 2) with block skip / mask /
    #   DMA-elision, c_proj grid (2, 2, 1).
    B, T, C = 2, 256, 512

    key = jax.random.PRNGKey(0)
    k_x, k_wa, k_ba, k_wp, k_bp = jax.random.split(key, 5)

    x = jax.random.normal(k_x, (B, T, C), dtype=jnp.float32)
    params = {
        # nn.Linear(C, 3C): stored as (in, out) so forward is x @ W + b
        "w_attn": 0.02 * jax.random.normal(k_wa, (C, 3 * C), dtype=jnp.float32),
        "b_attn": 0.01 * jax.random.normal(k_ba, (3 * C,), dtype=jnp.float32),
        # nn.Linear(C, C)
        "w_proj": 0.02 * jax.random.normal(k_wp, (C, C), dtype=jnp.float32),
        "b_proj": 0.01 * jax.random.normal(k_bp, (C,), dtype=jnp.float32),
    }

    # Path 1: head_dim = 128 -> fused (transpose-free) attention path.
    y = causal_self_attention(x, params, n_head=4)
    y = jax.block_until_ready(y)
    y_ref = reference_attention(x, params, n_head=4)
    assert y.shape == (B, T, C)
    err = float(jnp.max(jnp.abs(y - y_ref)))
    assert jnp.allclose(y, y_ref, atol=1e-2, rtol=1e-2), err

    # Path 2: head_dim = 64 -> fallback (head-layout) path, same kernel.
    y2 = causal_self_attention(x, params, n_head=8)
    y2 = jax.block_until_ready(y2)
    y2_ref = reference_attention(x, params, n_head=8)
    err2 = float(jnp.max(jnp.abs(y2 - y2_ref)))
    assert jnp.allclose(y2, y2_ref, atol=1e-2, rtol=1e-2), err2

    print("KERNEL_OK")
</pallas_src>

<mosaic_0001>
module attributes {stable_mosaic.version = 11 : i64} {
  func.func @_linear_kernel(%arg0: i32, %arg1: i32, %arg2: i32, %arg3: memref<256x512xf32, #tpu.memory_space<vmem>>, %arg4: memref<512x256xf32, #tpu.memory_space<vmem>>, %arg5: memref<1x256xf32, #tpu.memory_space<vmem>>, %arg6: memref<256x256xf32, #tpu.memory_space<vmem>>, %arg7: memref<256x256xf32, #tpu.memory_space<vmem>>) attributes {dimension_semantics = [#tpu.dimension_semantics<parallel>, #tpu.dimension_semantics<parallel>, #tpu.dimension_semantics<arbitrary>], iteration_bounds = array<i64: 2, 6, 1>, scalar_prefetch = 0 : i64, scratch_operands = 1 : i64, tpu.core_type = #tpu.core_type<tc>, window_params = [{transform_indices = @transform_0, window_bounds = array<i64: 256, 512>}, {transform_indices = @transform_1, window_bounds = array<i64: 512, 256>}, {transform_indices = @transform_2, window_bounds = array<i64: 1, 256>}, {transform_indices = @transform_3, window_bounds = array<i64: 256, 256>}]} {
    %c0_i32 = arith.constant 0 : i32
    %0 = arith.cmpi eq, %arg2, %c0_i32 : i32
    %1 = arith.extui %0 : i1 to i32
    %c0_i32_0 = arith.constant 0 : i32
    %2 = arith.cmpi ne, %1, %c0_i32_0 : i32
    scf.if %2 {
      %cst_10 = arith.constant 0.000000e+00 : f32
      %12 = vector.broadcast %cst_10 : f32 to vector<256x256xf32>
      %c0_11 = arith.constant 0 : index
      %c0_12 = arith.constant 0 : index
      %13 = vector.load %arg7[%c0_11, %c0_12] : memref<256x256xf32, #tpu.memory_space<vmem>>, vector<256x256xf32>
      tpu.vector_store %arg7[%c0_11, %c0_12], %12 {strides = array<i32>} : memref<256x256xf32, #tpu.memory_space<vmem>>, vector<256x256xf32>,
    } else {
    }
    %c0 = arith.constant 0 : index
    %c0_1 = arith.constant 0 : index
    %3 = vector.load %arg7[%c0, %c0_1] : memref<256x256xf32, #tpu.memory_space<vmem>>, vector<256x256xf32>
    %c0_2 = arith.constant 0 : index
    %c0_3 = arith.constant 0 : index
    %4 = vector.load %arg3[%c0_2, %c0_3] : memref<256x512xf32, #tpu.memory_space<vmem>>, vector<256x512xf32>
    %c0_4 = arith.constant 0 : index
    %c0_5 = arith.constant 0 : index
    %5 = vector.load %arg4[%c0_4, %c0_5] : memref<512x256xf32, #tpu.memory_space<vmem>>, vector<512x256xf32>
    %cst = arith.constant dense<0.000000e+00> : vector<256x256xf32>
    %6 = tpu.matmul %4, %5, %cst {dimension_numbers = #tpu.dot_dimension_numbers<[1], [0], [0], [1], [0, 0, 1, 1], [], []>} : vector<256x512xf32>, vector<512x256xf32>, vector<256x256xf32> -> vector<256x256xf32>
    %7 = arith.addf %3, %6 : vector<256x256xf32>
    %c0_6 = arith.constant 0 : index
    %c0_7 = arith.constant 0 : index
    %8 = vector.load %arg7[%c0_6, %c0_7] : memref<256x256xf32, #tpu.memory_space<vmem>>, vector<256x256xf32>
    tpu.vector_store %arg7[%c0_6, %c0_7], %7 {strides = array<i32>} : memref<256x256xf32, #tpu.memory_space<vmem>>, vector<256x256xf32>,
    %c0_i32_8 = arith.constant 0 : i32
    %9 = arith.cmpi eq, %arg2, %c0_i32_8 : i32
    %10 = arith.extui %9 : i1 to i32
    %c0_i32_9 = arith.constant 0 : i32
    %11 = arith.cmpi ne, %10, %c0_i32_9 : i32
    scf.if %11 {
      %c0_10 = arith.constant 0 : index
      %c0_11 = arith.constant 0 : index
      %12 = vector.load %arg7[%c0_10, %c0_11] : memref<256x256xf32, #tpu.memory_space<vmem>>, vector<256x256xf32>
      %c0_12 = arith.constant 0 : index
      %c0_13 = arith.constant 0 : index
      %13 = vector.load %arg5[%c0_12, %c0_13] : memref<1x256xf32, #tpu.memory_space<vmem>>, vector<1x256xf32>
      %14 = vector.broadcast %13 : vector<1x256xf32> to vector<256x256xf32>
      %15 = arith.addf %12, %14 : vector<256x256xf32>
      %c0_14 = arith.constant 0 : index
      %c0_15 = arith.constant 0 : index
      %16 = vector.load %arg6[%c0_14, %c0_15] : memref<256x256xf32, #tpu.memory_space<vmem>>, vector<256x256xf32>
      tpu.vector_store %arg6[%c0_14, %c0_15], %15 {strides = array<i32>} : memref<256x256xf32, #tpu.memory_space<vmem>>, vector<256x256xf32>,
    } else {
    }
    return
  }
  func.func @transform_0(%arg0: i32, %arg1: i32, %arg2: i32) -> (i32, i32) {
    %c0_i32 = arith.constant 0 : i32
    return %arg0, %arg2 : i32, i32
  }
  func.func @transform_1(%arg0: i32, %arg1: i32, %arg2: i32) -> (i32, i32) {
    %c0_i32 = arith.constant 0 : i32
    return %arg2, %arg1 : i32, i32
  }
  func.func @transform_2(%arg0: i32, %arg1: i32, %arg2: i32) -> (i32, i32) {
    %c0_i32 = arith.constant 0 : i32
    %c0_i32_0 = arith.constant 0 : i32
    return %c0_i32, %arg1 : i32, i32
  }
  func.func @transform_3(%arg0: i32, %arg1: i32, %arg2: i32) -> (i32, i32) {
    %c0_i32 = arith.constant 0 : i32
    return %arg0, %arg1 : i32, i32
  }
}

</mosaic_0001>

<bundles_post_ra>
// kernel: tpu_custom_call.1
= control target key start
LH: loop header
LB: loop body
LE: loop exit
PB: predicated region body
PF: predicated region fallthrough
CT: control target
= control target key end

     0   :  { %s3578_s0 = inlined_call_operand.hbm [shape: f32[512,512], index: 0, kind: input, shape index: {}]   ;;  %s3579_s1 = inlined_call_operand.hbm [shape: f32[512,1536], index: 1, kind: input, shape index: {}]   ;;  %s3580_s2 = inlined_call_operand.hbm [shape: f32[1,1536], index: 2, kind: input, shape index: {}]   ;;  %s3581_s3 = inlined_call_operand.hbm [shape: f32[512,1536], index: 3, kind: output, shape index: {}]  }
   0x1   :  { %3598 = sst [smem:[#allocation30_spill]] %s3578_s0 }
   0x2   :  { %3599 = sst [smem:[#allocation31_spill]] %s3579_s1 }
   0x3   :  { %3600 = sst [smem:[#allocation32_spill]] %s3581_s3 }
   0x4   :  { %8 = vsyncpa [#allocation4], 0 }
   0x5   :  { %10 = vsyncpa [#allocation4 + $0x1], 0 }
   0x6   :  { %11 = vsyncpa [#allocation7], 0 }
   0x7   :  { %13 = vsyncpa [#allocation7 + $0x1], 0 }
   0x8   :  { %14 = vsyncpa [#allocation5], 0 }
   0x9   :  { %16 = vsyncpa [#allocation5 + $0x1], 0  ;;  %s2606_s12 = smov 0   ;;  %s2608_s13 = smov 0  }
   0xa   :  { %s2610_s14 = smov 0   ;;  %s2612_s15 = smov 0  }
   0xb   :  { %s2614_s16 = smov 0   ;;  %s2616_s17 = smov 0  }
   0xc   :  { %s2618_s18 = smov 0   ;;  %s2620_s19 = smov 0  }
   0xd   :  { %s2622_s20 = smov 0   ;;  %s2624_s21 = smov 0  }
   0xe   :  { %s2626_s22 = smov 0   ;;  %s2628_s23 = smov 0  }
   0xf   :  { %s2630_s24 = smov 0   ;;  %s2632_s25 = smov 0  }
  0x10 LB: > { %3601 = sst [smem:[#allocation13_spill]] %s2524_s12  ;;  %s37_s26 = sadd.s32 1, %s2568_s23  ;;  %s2576_s25 = sphi %s2632_s25, %s22_s25   ;;  %s2572_s24 = sphi %s2630_s24, %s3648_s24   ;;  %s2568_s23 = sphi %s2628_s23, %s3658_s23   ;;  %s2564_s22 = sphi %s2626_s22, %s3657_s22   ;;  %s2560_s21 = sphi %s2624_s21, %s3656_s21   ;;  %s2556_s20 = sphi %s2622_s20, %s3645_s20   ;;  %s2552_s19 = sphi %s2620_s19, %s3655_s19   ;;  %s2548_s18 = sphi %s2618_s18, %s3654_s18   ;;  %s2544_s17 = sphi %s2616_s17, %s3653_s17   ;;  %s2540_s16 = sphi %s2614_s16, %s3652_s16   ;;  %s2536_s15 = sphi %s2612_s15, %s3651_s15   ;;  %s2532_s14 = sphi %s2610_s14, %s3642_s14   ;;  %s2528_s13 = sphi %s2608_s13, %s3650_s13   ;;  %s2524_s12 = sphi %s2606_s12, %s3649_s12  }
  0x11   : > { %3602 = sst [smem:[#allocation14_spill]] %s2532_s14  ;;  %p58_p0 = scmp.eq.s32.totalorder %s2576_s25, 0 }
  0x12   : > { %3603 = sst [smem:[#allocation15_spill]] %s2556_s20  ;;  %p2680_p1 = scmp.ge.s32.totalorder %s37_s26, 6 }
  0x13   : > { %3604 = sst [smem:[#allocation16_spill]] %s2560_s21  ;;  %p85_p2 = scmp.ne.s32.totalorder %s2544_s17, %s2540_s16 }
  0x14   : > { %3605 = sst [smem:[#allocation17_spill]] %s2572_s24  ;;  %p91_p3 = scmp.ne.s32.totalorder %s2540_s16, %s2536_s15 }
  0x15   : > { %p2137_p4 = scmp.lt.s32.totalorder %s2576_s25, 12  ;;  %p87_p5 = por %p85_p2, %p58_p0 }
  0x16   : > { %s194_s29 = sand.u32 1, %s2576_s25   ;;  %s3582_s30 = sand.u32 1, %s2544_s17  }
  0x17   : > { %s2094_s4 = sshll.u32 %s3582_s30, 10  ;;  %s2113_s5 = sshll.u32 %s2568_s23, 4 }
  0x18   : > { %s3607_s1 = sld [smem:[#allocation31_spill]]  ;;  %s198_s10 = scalar_lea.vmem [#allocation6], %s2094_s4 }
  0x19   : > { %s209_s11 = sshll.u32 %s198_s10, 4  ;;  %p2702_p6 = pnand %p2137_p4, %p87_p5  ;;  %s210_s11 = int_to_ptr.vmem [resolvable:$true] %s209_s11 }
  0x1a   : > { %p2099_p7 = scmp.ge.s32.totalorder %s2576_s25, 1  ;;  %s2578_s4 = smov 1536  }
  0x1b   : > { %s2579_s6 = smov 256   ;;  %s2580_s7 = smov 16  }
  0x1c   : > { %p236_p8 = scmp.lt.s32.totalorder %s2576_s25, 13  ;;  %s2718_s10 = sadd.s32 4294967295, %s2576_s25  }
  0x1d   : > { %s3660_s26 = smov (%p2680_p1, %s37_s26), 0  ;;  %s41_s28 = sadd.s32 1, %s2572_s24 }
  0x1e   : > { %s206_s8 = scalar_lea.hbm %s3607_s1, %s2113_s5  ;;  %s2707_s5 = scalar_lea.sflag [#allocation7], %s194_s29 }
  0x1f   : > { %s207_s9 = sshll.u32 %s206_s8, 4  ;;  %p2713_p9 = pnand %p2099_p7, %p236_p8  ;;  %s208_s9 = int_to_ptr.hbm [resolvable:$true] %s207_s9 }
  0x20   : > { %2129 = dma.hbm_to_vmem [thread:$0]  (!%p2702_p6), %s208_s9, 16384, %s210_s11, %s2707_s5, %s2578_s4, %s2579_s6, %s2580_s7  }
  0x21   : > { %s2087_s29 = sadd.s32 4294967294, %s2576_s25   ;;  %3610 = sst [smem:[#allocation18_spill]] %s3660_s26 }
  0x22   : > { %s50_s9 = sadd.s32 1, %s2556_s20  ;;  %s3662_s28 = smov (!%p2680_p1, %s41_s28), %s2572_s24 }
  0x23   : > { %p57_p10 = scmp.ne.s32.totalorder %s2556_s20, %s2552_s19  ;;  %p63_p11 = scmp.ne.s32.totalorder %s2552_s19, %s2548_s18 }
  0x24   : > { %p43_p12 = scmp.ge.s32.totalorder %s3662_s28, 2  ;;  %p64_p13 = scmp.eq.s32.totalorder %s2718_s10, 0 }
  0x25   : > { %p2739_p2 = por %p58_p0, %p57_p10  ;;  %s74_s4 = ssub.s32 %s2568_s23, %s3660_s26 }
  0x26   : > { %s3664_s28 = smov (%p43_p12, %s3662_s28), 0  ;;  %p2747_p1 = por %p64_p13, %p63_p11 }
  0x27   : > { %3612 = sst [smem:[#allocation19_spill]] %s3664_s28  ;;  %p76_p5 = scmp.eq.s32.totalorder %s74_s4, 0 }
  0x28   : > { %s45_s18 = ssub.s32 %s2572_s24, %s3664_s28  ;;  %p2756_p7 = por %p91_p3, %p64_p13 }
  0x29   : > { %p48_p0 = scmp.eq.s32.totalorder %s45_s18, 0  ;;  %s129_s7 = sor.u32 %s74_s4, %s45_s18 }
  0x2a   : > { %s3615_s1 = sadd.s32 1, %s2544_s17  ;;  %p130_p8 = scmp.eq.s32.totalorder %s129_s7, 0 }
  0x2b   : > { %s2763_s26 = scalar_select %p76_p5, %s2544_s17, %s3615_s1  }
  0x2c   : > { %s2766_s3 = scalar_select %p48_p0, %s2556_s20, %s50_s9  }
  0x2d   : > { %3616 = sst [smem:[#allocation20_spill]] %s2763_s26  ;;  %s132_s21 = sadd.s32 1, %s2532_s14 }
  0x2e   : > { %3617 = sst [smem:[#allocation21_spill]] %s2766_s3  ;;  %p142_p10 = scmp.ne.s32.totalorder %s2532_s14, %s2528_s13 }
  0x2f   : > { %p143_p11 = scmp.eq.s32.totalorder %s2718_s10, 11  ;;  %p148_p12 = scmp.ne.s32.totalorder %s2528_s13, %s2524_s12 }
  0x30   : > { %s2773_s28 = scalar_select %p130_p8, %s2532_s14, %s132_s21  }
  0x31   : > { %p2775_p3 = por %p143_p11, %p142_p10  ;;  %p149_p13 = scmp.eq.s32.totalorder %s2087_s29, 11 }
  0x32   : > { %3618 = sst [smem:[#allocation22_spill]] %s2773_s28  ;;  %s169_s4 = sand.u32 1, %s2556_s20  }
  0x33   : > { %s3619_s15 = scalar_select %p2775_p3, 1, 0 }
  0x34   : > { %s2090_s1 = sshll.u32 %s169_s4, 10  ;;  %p2782_p5 = por %p149_p13, %p148_p12 }
  0x35   : > { %3620 = sst [smem:[#allocation23_spill]] %s3619_s15  ;;  %s2112_s18 = sshll.u32 %s2572_s24, 10 }
  0x36   : > { %s3621_s9 = scalar_select %p2782_p5, 1, 0 }
  0x37   : > { %s173_s7 = scalar_lea.vmem [#allocation3], %s2090_s1  ;;  %s3623_s0 = sld [smem:[#allocation30_spill]] }
  0x38   : > { %3622 = sst [smem:[#allocation24_spill]] %s3621_s9  ;;  %s184_s3 = sshll.u32 %s173_s7, 4  ;;  %s185_s3 = int_to_ptr.vmem [resolvable:$true] %s184_s3 }
  0x39   : > { %p2124_p0 = pnand %p2137_p4, %p2739_p2  ;;  %s170_s29 = scalar_lea.sflag [#allocation4], %s169_s4 }
  0x3a   : > { %s2581_s20 = smov 512   ;;  %s2582_s12 = smov 32  }
  0x3b   : > { %s3624_s9 = sand.u32 1, %s2544_s17   ;;  %s2098_s1 = sshll.u32 %s2568_s23, 1 }
  0x3c   : > { %s2097_s24 = sshll.u32 %s3624_s9, 1  ;;  %s227_s26 = scalar_lea.hbm %s3580_s2, %s2098_s1 }
  0x3d   : > { %s181_s28 = scalar_lea.hbm %s3623_s0, %s2112_s18  ;;  %s229_s18 = sshll.u32 %s227_s26, 4  ;;  %s230_s18 = int_to_ptr.hbm [resolvable:$true] %s229_s18 }
  0x3e   : > { %s182_s14 = sshll.u32 %s181_s28, 4  ;;  %s223_s21 = scalar_lea.vmem [#allocation8], %s2097_s24  ;;  %s183_s14 = int_to_ptr.hbm [resolvable:$true] %s182_s14 }
  0x3f   : > { %2126 = dma.hbm_to_vmem [thread:$0]  (!%p2124_p0), %s183_s14, 16384, %s185_s3, %s170_s29, %s2581_s20, %s2581_s20, %s2582_s12  }
  0x40   : > { %s231_s0 = sshll.u32 %s223_s21, 4  ;;  %240 = sbr.rel (%p2713_p9) target bundleno = 757 (0x2f5), region = 32  ;;  %s232_s0 = int_to_ptr.vmem [resolvable:$true] %s231_s0 }
  0x41   : > { %2132 = dma.hbm_to_vmem [thread:$0]  (!%p2702_p6), %s230_s18, 32, %s232_s0, %s2707_s5  }
  0x45   : > { %s242_s3 = sand.u32 1, %s2552_s19  }
  0x46   : > { %s2100_s12 = sshll.u32 %s242_s3, 10  ;;  %s243_s14 = scalar_lea.sflag [#allocation4], %s242_s3 }
  0x47   : > { %s2806_s20 = scalar_lea.vmem [#allocation3], %s2100_s12 }
  0x48   : > { %2511 = dma.done.wait (%p2747_p1), %s243_s14, 16384  }
  0x49   : > { %2513 = vsyncadd (%p2747_p1), %s243_s14, 4294950912  ;;  %s252_s0 = sand.u32 1, %s2718_s10   ;;  %s254_s24 = sand.u32 1, %s2540_s16  }
  0x4a   : > { %s2101_s28 = sshll.u32 %s254_s24, 10  ;;  %s253_s30 = scalar_lea.sflag [#allocation7], %s252_s0 }
  0x4b   : > { %s2816_s5 = scalar_lea.vmem [#allocation6], %s2101_s28 }
  0x4c   : > { %2515 = dma.done.wait (%p2756_p7), %s253_s30, 16416  }
  0x4d   : > { %2517 = vsyncadd (%p2756_p7), %s253_s30, 4294950880  ;;  %v661_v0 = vld [vmem:[%s2816_s5 + $0x2f0] sm:$0xff]  ;;  %v659_v1 = vld [vmem:[%s2816_s5 + $0x2e0] sm:$0xff]  ;;  %s2992_s8 = sshll.u32 %s254_s24, 1  ;;  %s297_s10 = sand.u32 1, %s2528_s13  }
  0x4e   : > { %v693_v2 = vld [vmem:[%s2816_s5 + $0x3f0] sm:$0xff]  ;;  %921 = vmatpush.msra.mxu2 %v661_v0  ;;  %v691_v6 = vld [vmem:[%s2816_s5 + $0x3e0] sm:$0xff]  ;;  %v442_v63 = vld [vmem:[%s2806_s20 + $0x18] sm:$0xff]  ;;  %s266_s11 = scalar_lea.vmem [#allocation8], %s2992_s8  ;;  %s2103_s27 = sshll.u32 %s297_s10, 9 }
  0x4f   : > { %1034 = vmatpush.msra.mxu3 %v693_v2  ;;  %v597_v3 = vld [vmem:[%s2816_s5 + $0xf0] sm:$0xff]  ;;  %v595_v7 = vld [vmem:[%s2816_s5 + $0xe0] sm:$0xff]  ;;  %v662_v0 = vld [vmem:[%s2816_s5 + $0x2f8] sm:$0xff]  ;;  %s3015_s6 = scalar_lea.vmem [#allocation9], %s2103_s27  ;;  %s3635_s15 = sld [smem:[#allocation16_spill]] }
  0x50   : > { %v629_v4 = vld [vmem:[%s2816_s5 + $0x1f0] sm:$0xff]  ;;  %695 = vmatpush.msra.mxu0 %v597_v3  ;;  %v627_v8 = vld [vmem:[%s2816_s5 + $0x1e0] sm:$0xff]  ;;  %922 = vmatpush.msra.mxu2 %v659_v1  ;;  %v694_v1 = vld [vmem:[%s2816_s5 + $0x3f8] sm:$0xff]  ;;  %s2114_s4 = smul.u32 384, %s2564_s22  ;;  %s3636_s26 = sld [smem:[#allocation32_spill]] }
  0x51   : > { %v657_v5 = vld [vmem:[%s2816_s5 + $0x2d0] sm:$0xff]  ;;  %808 = vmatpush.msra.mxu1 %v629_v4  ;;  %1035 = vmatpush.msra.mxu3 %v691_v6  ;;  %v655_v11 = vld [vmem:[%s2816_s5 + $0x2c0] sm:$0xff]  ;;  %v598_v6 = vld [vmem:[%s2816_s5 + $0xf8] sm:$0xff]  ;;  %s1944_s3 = sshll.u32 %s3015_s6, 4  ;;  %s1929_s14 = scalar_lea.sflag [#allocation5], %s297_s10  ;;  %s1945_s3 = int_to_ptr.vmem [resolvable:$true] %s1944_s3 }
  0x52   : > { %v689_v9 = vld [vmem:[%s2816_s5 + $0x3d0] sm:$0xff]  ;;  %696 = vmatpush.msra.mxu0 %v595_v7  ;;  %v687_v13 = vld [vmem:[%s2816_s5 + $0x3c0] sm:$0xff]  ;;  %923 = vmatpush.msra.mxu2 %v657_v5  ;;  %v440_v5 = vld [vmem:[%s2806_s20 + $0x8] sm:$0xff] }
  0x53   : > { %v593_v10 = vld [vmem:[%s2816_s5 + $0xd0] sm:$0xff]  ;;  %809 = vmatpush.msra.mxu1 %v627_v8  ;;  %1036 = vmatpush.msra.mxu3 %v689_v9  ;;  %v591_v14 = vld [vmem:[%s2816_s5 + $0xc0] sm:$0xff]  ;;  %v630_v7 = vld [vmem:[%s2816_s5 + $0x1f8] sm:$0xff] }
  0x54   : > { %v625_v12 = vld [vmem:[%s2816_s5 + $0x1d0] sm:$0xff]  ;;  %v623_v15 = vld [vmem:[%s2816_s5 + $0x1c0] sm:$0xff]  ;;  %697 = vmatpush.msra.mxu0 %v593_v10  ;;  %924 = vmatpush.msra.mxu2 %v655_v11  ;;  %v660_v8 = vld [vmem:[%s2816_s5 + $0x2e8] sm:$0xff] }
  0x55   : > { %810 = vmatpush.msra.mxu1 %v625_v12  ;;  %v653_v16 = vld [vmem:[%s2816_s5 + $0x2b0] sm:$0xff]  ;;  %1037 = vmatpush.msra.mxu3 %v687_v13  ;;  %v651_v20 = vld [vmem:[%s2816_s5 + $0x2a0] sm:$0xff]  ;;  %v692_v9 = vld [vmem:[%s2816_s5 + $0x3e8] sm:$0xff]  ;;  %s2106_s9 = sshll.u32 %s3635_s15, 1 }
  0x56   : > { %v685_v17 = vld [vmem:[%s2816_s5 + $0x3b0] sm:$0xff]  ;;  %698 = vmatpush.msra.mxu0 %v591_v14  ;;  %v683_v21 = vld [vmem:[%s2816_s5 + $0x3a0] sm:$0xff]  ;;  %925 = vmatpush.msra.mxu2 %v653_v16  ;;  %v596_v10 = vld [vmem:[%s2816_s5 + $0xe8] sm:$0xff]  ;;  %s1941_s29 = sadd.s32 %s2114_s4, %s2106_s9  ;;  %s2446_s30 = scalar_lea.hbm %s3636_s26, 6144 }
  0x57   : > { %v589_v18 = vld [vmem:[%s2816_s5 + $0xb0] sm:$0xff]  ;;  %811 = vmatpush.msra.mxu1 %v623_v15  ;;  %1038 = vmatpush.msra.mxu3 %v685_v17  ;;  %v587_v22 = vld [vmem:[%s2816_s5 + $0xa0] sm:$0xff]  ;;  %v628_v11 = vld [vmem:[%s2816_s5 + $0x1e8] sm:$0xff]  ;;  %s2108_s1 = sshll.u32 %s1941_s29, 3 }
  0x58   : > { %v621_v19 = vld [vmem:[%s2816_s5 + $0x1b0] sm:$0xff]  ;;  %v619_v23 = vld [vmem:[%s2816_s5 + $0x1a0] sm:$0xff]  ;;  %699 = vmatpush.msra.mxu0 %v589_v18  ;;  %926 = vmatpush.msra.mxu2 %v651_v20  ;;  %v658_v12 = vld [vmem:[%s2816_s5 + $0x2d8] sm:$0xff]  ;;  %s1943_s18 = scalar_lea.hbm %s3636_s26, %s2108_s1 }
  0x59   : > { %812 = vmatpush.msra.mxu1 %v621_v19  ;;  %v649_v24 = vld [vmem:[%s2816_s5 + $0x290] sm:$0xff]  ;;  %1039 = vmatpush.msra.mxu3 %v683_v21  ;;  %v647_v28 = vld [vmem:[%s2816_s5 + $0x280] sm:$0xff]  ;;  %v690_v13 = vld [vmem:[%s2816_s5 + $0x3d8] sm:$0xff]  ;;  %s1946_s12 = sshll.u32 %s1943_s18, 4  ;;  %s1947_s12 = int_to_ptr.hbm [resolvable:$true] %s1946_s12 }
  0x5a   : > { %v681_v25 = vld [vmem:[%s2816_s5 + $0x390] sm:$0xff]  ;;  %700 = vmatpush.msra.mxu0 %v587_v22  ;;  %v679_v29 = vld [vmem:[%s2816_s5 + $0x380] sm:$0xff]  ;;  %927 = vmatpush.msra.mxu2 %v649_v24  ;;  %v446_v15 = vld [vmem:[%s2806_s20 + $0x38] sm:$0xff] }
  0x5b   : > { %v585_v26 = vld [vmem:[%s2816_s5 + $0x90] sm:$0xff]  ;;  %813 = vmatpush.msra.mxu1 %v619_v23  ;;  %1040 = vmatpush.msra.mxu3 %v681_v25  ;;  %v583_v30 = vld [vmem:[%s2816_s5 + $0x80] sm:$0xff]  ;;  %v594_v16 = vld [vmem:[%s2816_s5 + $0xd8] sm:$0xff] }
  0x5c   : > { %v617_v27 = vld [vmem:[%s2816_s5 + $0x190] sm:$0xff]  ;;  %v615_v31 = vld [vmem:[%s2816_s5 + $0x180] sm:$0xff]  ;;  %701 = vmatpush.msra.mxu0 %v585_v26  ;;  %928 = vmatpush.msra.mxu2 %v647_v28  ;;  %v626_v17 = vld [vmem:[%s2816_s5 + $0x1d8] sm:$0xff] }
  0x5d   : > { %814 = vmatpush.msra.mxu1 %v617_v27  ;;  %v645_v32 = vld [vmem:[%s2816_s5 + $0x270] sm:$0xff]  ;;  %1041 = vmatpush.msra.mxu3 %v679_v29  ;;  %v643_v36 = vld [vmem:[%s2816_s5 + $0x260] sm:$0xff]  ;;  %v444_v19 = vld [vmem:[%s2806_s20 + $0x28] sm:$0xff] }
  0x5e   : > { %v677_v33 = vld [vmem:[%s2816_s5 + $0x370] sm:$0xff]  ;;  %702 = vmatpush.msra.mxu0 %v583_v30  ;;  %v675_v37 = vld [vmem:[%s2816_s5 + $0x360] sm:$0xff]  ;;  %929 = vmatpush.msra.mxu2 %v645_v32  ;;  %v450_v21 = vld [vmem:[%s2806_s20 + $0x58] sm:$0xff] }
  0x5f   : > { %v581_v34 = vld [vmem:[%s2816_s5 + $0x70] sm:$0xff]  ;;  %815 = vmatpush.msra.mxu1 %v615_v31  ;;  %1042 = vmatpush.msra.mxu3 %v677_v33  ;;  %v579_v38 = vld [vmem:[%s2816_s5 + $0x60] sm:$0xff]  ;;  %v448_v23 = vld [vmem:[%s2806_s20 + $0x48] sm:$0xff] }
  0x60   : > { %v613_v35 = vld [vmem:[%s2816_s5 + $0x170] sm:$0xff]  ;;  %v611_v39 = vld [vmem:[%s2816_s5 + $0x160] sm:$0xff]  ;;  %703 = vmatpush.msra.mxu0 %v581_v34  ;;  %930 = vmatpush.msra.mxu2 %v643_v36  ;;  %v656_v24 = vld [vmem:[%s2816_s5 + $0x2c8] sm:$0xff] }
  0x61   : > { %816 = vmatpush.msra.mxu1 %v613_v35  ;;  %v641_v40 = vld [vmem:[%s2816_s5 + $0x250] sm:$0xff]  ;;  %1043 = vmatpush.msra.mxu3 %v675_v37  ;;  %v639_v44 = vld [vmem:[%s2816_s5 + $0x240] sm:$0xff]  ;;  %v688_v25 = vld [vmem:[%s2816_s5 + $0x3c8] sm:$0xff] }
  0x62   : > { %v673_v41 = vld [vmem:[%s2816_s5 + $0x350] sm:$0xff]  ;;  %704 = vmatpush.msra.mxu0 %v579_v38  ;;  %v671_v45 = vld [vmem:[%s2816_s5 + $0x340] sm:$0xff]  ;;  %931 = vmatpush.msra.mxu2 %v641_v40  ;;  %v592_v26 = vld [vmem:[%s2816_s5 + $0xc8] sm:$0xff] }
  0x63   : > { %v577_v42 = vld [vmem:[%s2816_s5 + $0x50] sm:$0xff]  ;;  %817 = vmatpush.msra.mxu1 %v611_v39  ;;  %1044 = vmatpush.msra.mxu3 %v673_v41  ;;  %v575_v46 = vld [vmem:[%s2816_s5 + $0x40] sm:$0xff]  ;;  %v624_v27 = vld [vmem:[%s2816_s5 + $0x1c8] sm:$0xff] }
  0x64   : > { %v609_v43 = vld [vmem:[%s2816_s5 + $0x150] sm:$0xff]  ;;  %v607_v47 = vld [vmem:[%s2816_s5 + $0x140] sm:$0xff]  ;;  %705 = vmatpush.msra.mxu0 %v577_v42  ;;  %932 = vmatpush.msra.mxu2 %v639_v44  ;;  %v454_v29 = vld [vmem:[%s2806_s20 + $0x78] sm:$0xff] }
  0x65   : > { %818 = vmatpush.msra.mxu1 %v609_v43  ;;  %v637_v48 = vld [vmem:[%s2816_s5 + $0x230] sm:$0xff]  ;;  %1045 = vmatpush.msra.mxu3 %v671_v45  ;;  %v635_v52 = vld [vmem:[%s2816_s5 + $0x220] sm:$0xff]  ;;  %v452_v31 = vld [vmem:[%s2806_s20 + $0x68] sm:$0xff] }
  0x66   : > { %v669_v49 = vld [vmem:[%s2816_s5 + $0x330] sm:$0xff]  ;;  %706 = vmatpush.msra.mxu0 %v575_v46  ;;  %v667_v53 = vld [vmem:[%s2816_s5 + $0x320] sm:$0xff]  ;;  %933 = vmatpush.msra.mxu2 %v637_v48  ;;  %v458_v33 = vld [vmem:[%s2806_s20 + $0x98] sm:$0xff] }
  0x67   : > { %v573_v50 = vld [vmem:[%s2816_s5 + $0x30] sm:$0xff]  ;;  %819 = vmatpush.msra.mxu1 %v607_v47  ;;  %1046 = vmatpush.msra.mxu3 %v669_v49  ;;  %v571_v54 = vld [vmem:[%s2816_s5 + $0x20] sm:$0xff]  ;;  %v456_v35 = vld [vmem:[%s2806_s20 + $0x88] sm:$0xff] }
  0x68   : > { %v605_v51 = vld [vmem:[%s2816_s5 + $0x130] sm:$0xff]  ;;  %v603_v55 = vld [vmem:[%s2816_s5 + $0x120] sm:$0xff]  ;;  %707 = vmatpush.msra.mxu0 %v573_v50  ;;  %934 = vmatpush.msra.mxu2 %v635_v52  ;;  %v654_v36 = vld [vmem:[%s2816_s5 + $0x2b8] sm:$0xff] }
  0x69   : > { %820 = vmatpush.msra.mxu1 %v605_v51  ;;  %v633_v56 = vld [vmem:[%s2816_s5 + $0x210] sm:$0xff]  ;;  %1047 = vmatpush.msra.mxu3 %v667_v53  ;;  %v631_v60 = vld [vmem:[%s2816_s5 + $0x200] sm:$0xff]  ;;  %v686_v37 = vld [vmem:[%s2816_s5 + $0x3b8] sm:$0xff] }
  0x6a   : > { %v665_v57 = vld [vmem:[%s2816_s5 + $0x310] sm:$0xff]  ;;  %708 = vmatpush.msra.mxu0 %v571_v54  ;;  %v663_v61 = vld [vmem:[%s2816_s5 + $0x300] sm:$0xff]  ;;  %935 = vmatpush.msra.mxu2 %v633_v56  ;;  %v590_v38 = vld [vmem:[%s2816_s5 + $0xb8] sm:$0xff] }
  0x6b   : > { %v569_v58 = vld [vmem:[%s2816_s5 + $0x10] sm:$0xff]  ;;  %821 = vmatpush.msra.mxu1 %v603_v55  ;;  %1048 = vmatpush.msra.mxu3 %v665_v57  ;;  %v567_v2 = vld [vmem:[%s2816_s5] sm:$0xff]  ;;  %v622_v39 = vld [vmem:[%s2816_s5 + $0x1b8] sm:$0xff] }
  0x6c   : > { %v601_v59 = vld [vmem:[%s2816_s5 + $0x110] sm:$0xff]  ;;  %709 = vmatpush.msra.mxu0 %v569_v58  ;;  %936 = vmatpush.msra.mxu2 %v631_v60  ;;  %v599_v3 = vld [vmem:[%s2816_s5 + $0x100] sm:$0xff]  ;;  %v462_v41 = vld [vmem:[%s2806_s20 + $0xb8] sm:$0xff] }
  0x6d   : > { %v441_v62 = vld [vmem:[%s2806_s20 + $0x10] sm:$0xff]  ;;  %822 = vmatpush.msra.mxu1 %v601_v59  ;;  %1049 = vmatpush.msra.mxu3 %v663_v61  ;;  %v439_v4 = vld [vmem:[%s2806_s20] sm:$0xff]  ;;  %v460_v43 = vld [vmem:[%s2806_s20 + $0xa8] sm:$0xff] }
  0x6e   : > { %937 = vmatmul.f32.vlgmr.msra.gmra.mxu2 %v441_v62  ;;  %1050 = vmatmul.f32.vlgmr.msra.gmra.mxu3 %v442_v63  ;;  %v445_v14 = vld [vmem:[%s2806_s20 + $0x30] sm:$0xff]  ;;  %v443_v18 = vld [vmem:[%s2806_s20 + $0x20] sm:$0xff]  ;;  %v466_v45 = vld [vmem:[%s2806_s20 + $0xd8] sm:$0xff] }
  0x6f   : > { %1373 = vmatpush.msrb.mxu2 %v662_v0  ;;  %1486 = vmatpush.msrb.mxu3 %v694_v1  ;;  %v449_v20 = vld [vmem:[%s2806_s20 + $0x50] sm:$0xff]  ;;  %v447_v22 = vld [vmem:[%s2806_s20 + $0x40] sm:$0xff]  ;;  %v464_v47 = vld [vmem:[%s2806_s20 + $0xc8] sm:$0xff] }
  0x70   : > { %710 = vmatpush.msra.mxu0 %v567_v2  ;;  %823 = vmatpush.msra.mxu1 %v599_v3  ;;  %v453_v28 = vld [vmem:[%s2806_s20 + $0x70] sm:$0xff]  ;;  %v451_v30 = vld [vmem:[%s2806_s20 + $0x60] sm:$0xff]  ;;  %v652_v48 = vld [vmem:[%s2816_s5 + $0x2a8] sm:$0xff] }
  0x71   : > { %711 = vmatmul.f32.vlgmr.msra.gmra.mxu0 %v439_v4  ;;  %824 = vmatmul.f32.vlgmr.msra.gmra.mxu1 %v440_v5  ;;  %v457_v32 = vld [vmem:[%s2806_s20 + $0x90] sm:$0xff]  ;;  %v455_v34 = vld [vmem:[%s2806_s20 + $0x80] sm:$0xff]  ;;  %v684_v49 = vld [vmem:[%s2816_s5 + $0x3a8] sm:$0xff] }
  0x72   : > { %1147 = vmatpush.msrb.mxu0 %v598_v6  ;;  %1260 = vmatpush.msrb.mxu1 %v630_v7  ;;  %v461_v40 = vld [vmem:[%s2806_s20 + $0xb0] sm:$0xff]  ;;  %v459_v42 = vld [vmem:[%s2806_s20 + $0xa0] sm:$0xff]  ;;  %v588_v50 = vld [vmem:[%s2816_s5 + $0xa8] sm:$0xff] }
  0x73   : > { %1374 = vmatpush.msrb.mxu2 %v660_v8  ;;  %1487 = vmatpush.msrb.mxu3 %v692_v9  ;;  %v465_v44 = vld [vmem:[%s2806_s20 + $0xd0] sm:$0xff]  ;;  %v463_v46 = vld [vmem:[%s2806_s20 + $0xc0] sm:$0xff]  ;;  %v620_v51 = vld [vmem:[%s2816_s5 + $0x1a8] sm:$0xff] }
  0x74   : > { %1148 = vmatpush.msrb.mxu0 %v596_v10  ;;  %1261 = vmatpush.msrb.mxu1 %v628_v11  ;;  %v469_v52 = vld [vmem:[%s2806_s20 + $0xf0] sm:$0xff]  ;;  %v470_v53 = vld [vmem:[%s2806_s20 + $0xf8] sm:$0xff]  ;;  %v467_v54 = vld [vmem:[%s2806_s20 + $0xe0] sm:$0xff] }
  0x75   : > { %1375 = vmatpush.msrb.mxu2 %v658_v12  ;;  %1488 = vmatpush.msrb.mxu3 %v690_v13  ;;  %v468_v55 = vld [vmem:[%s2806_s20 + $0xe8] sm:$0xff]  ;;  %v473_v56 = vld [vmem:[%s2806_s20 + $0x110] sm:$0xff]  ;;  %v474_v57 = vld [vmem:[%s2806_s20 + $0x118] sm:$0xff] }
  0x76   : > { %940 = vmatmul.f32.gmra.mxu2 %v445_v14  ;;  %1053 = vmatmul.f32.gmra.mxu3 %v446_v15  ;;  %v471_v58 = vld [vmem:[%s2806_s20 + $0x100] sm:$0xff]  ;;  %v472_v59 = vld [vmem:[%s2806_s20 + $0x108] sm:$0xff]  ;;  %v650_v60 = vld [vmem:[%s2816_s5 + $0x298] sm:$0xff] }
  0x77   : > { %1149 = vmatpush.msrb.mxu0 %v594_v16  ;;  %1262 = vmatpush.msrb.mxu1 %v626_v17  ;;  %v682_v61 = vld [vmem:[%s2816_s5 + $0x398] sm:$0xff]  ;;  %v477_v0 = vld [vmem:[%s2806_s20 + $0x130] sm:$0xff]  ;;  %v475_v2 = vld [vmem:[%s2806_s20 + $0x120] sm:$0xff] }
  0x78   : > { %1376 = vmatpush.msrb.mxu2 %v656_v24  ;;  %1489 = vmatpush.msrb.mxu3 %v688_v25  ;;  %v586_v62 = vld [vmem:[%s2816_s5 + $0x98] sm:$0xff]  ;;  %v476_v3 = vld [vmem:[%s2806_s20 + $0x128] sm:$0xff]  ;;  %v481_v4 = vld [vmem:[%s2806_s20 + $0x150] sm:$0xff] }
  0x79   : > { %714 = vmatmul.f32.gmra.mxu0 %v443_v18  ;;  %827 = vmatmul.f32.gmra.mxu1 %v444_v19  ;;  %v618_v63 = vld [vmem:[%s2816_s5 + $0x198] sm:$0xff]  ;;  %v479_v6 = vld [vmem:[%s2806_s20 + $0x140] sm:$0xff]  ;;  %v480_v7 = vld [vmem:[%s2806_s20 + $0x148] sm:$0xff] }
  0x7a   : > { %1150 = vmatpush.msrb.mxu0 %v592_v26  ;;  %1263 = vmatpush.msrb.mxu1 %v624_v27  ;;  %v478_v1 = vld [vmem:[%s2806_s20 + $0x138] sm:$0xff]  ;;  %v648_v8 = vld [vmem:[%s2816_s5 + $0x288] sm:$0xff]  ;;  %v485_v12 = vld [vmem:[%s2806_s20 + $0x170] sm:$0xff] }
  0x7b   : > { %1377 = vmatpush.msrb.mxu2 %v654_v36  ;;  %1490 = vmatpush.msrb.mxu3 %v686_v37  ;;  %v482_v5 = vld [vmem:[%s2806_s20 + $0x158] sm:$0xff]  ;;  %v680_v9 = vld [vmem:[%s2816_s5 + $0x388] sm:$0xff]  ;;  %v483_v14 = vld [vmem:[%s2806_s20 + $0x160] sm:$0xff] }
  0x7c   : > { %1151 = vmatpush.msrb.mxu0 %v590_v38  ;;  %1264 = vmatpush.msrb.mxu1 %v622_v39  ;;  %v584_v10 = vld [vmem:[%s2816_s5 + $0x88] sm:$0xff]  ;;  %v486_v13 = vld [vmem:[%s2806_s20 + $0x178] sm:$0xff]  ;;  %v489_v16 = vld [vmem:[%s2806_s20 + $0x190] sm:$0xff] }
  0x7d   : > { %1378 = vmatpush.msrb.mxu2 %v652_v48  ;;  %1491 = vmatpush.msrb.mxu3 %v684_v49  ;;  %v616_v11 = vld [vmem:[%s2816_s5 + $0x188] sm:$0xff]  ;;  %v490_v17 = vld [vmem:[%s2806_s20 + $0x198] sm:$0xff]  ;;  %v487_v18 = vld [vmem:[%s2806_s20 + $0x180] sm:$0xff] }
  0x7e   : > { %943 = vmatmul.f32.gmra.mxu2 %v449_v20  ;;  %1056 = vmatmul.f32.gmra.mxu3 %v450_v21  ;;  %v484_v15 = vld [vmem:[%s2806_s20 + $0x168] sm:$0xff]  ;;  %v646_v20 = vld [vmem:[%s2816_s5 + $0x278] sm:$0xff]  ;;  %v493_v24 = vld [vmem:[%s2806_s20 + $0x1b0] sm:$0xff] }
  0x7f   : > { %1152 = vmatpush.msrb.mxu0 %v588_v50  ;;  %1265 = vmatpush.msrb.mxu1 %v620_v51  ;;  %v488_v19 = vld [vmem:[%s2806_s20 + $0x188] sm:$0xff]  ;;  %v678_v21 = vld [vmem:[%s2816_s5 + $0x378] sm:$0xff]  ;;  %v491_v26 = vld [vmem:[%s2806_s20 + $0x1a0] sm:$0xff] }
  0x80   : > { %1379 = vmatpush.msrb.mxu2 %v650_v60  ;;  %1492 = vmatpush.msrb.mxu3 %v682_v61  ;;  %v494_v25 = vld [vmem:[%s2806_s20 + $0x1b8] sm:$0xff]  ;;  %v492_v27 = vld [vmem:[%s2806_s20 + $0x1a8] sm:$0xff]  ;;  %v501_v36 = vld [vmem:[%s2806_s20 + $0x1f0] sm:$0xff] }
  0x81   : > { %717 = vmatmul.f32.gmra.mxu0 %v447_v22  ;;  %830 = vmatmul.f32.gmra.mxu1 %v448_v23  ;;  %v582_v22 = vld [vmem:[%s2816_s5 + $0x78] sm:$0xff]  ;;  %v499_v38 = vld [vmem:[%s2806_s20 + $0x1e0] sm:$0xff]  ;;  %v500_v39 = vld [vmem:[%s2806_s20 + $0x1e8] sm:$0xff] }
  0x82   : > { %1153 = vmatpush.msrb.mxu0 %v586_v62  ;;  %1266 = vmatpush.msrb.mxu1 %v618_v63  ;;  %v614_v23 = vld [vmem:[%s2816_s5 + $0x178] sm:$0xff]  ;;  %v507_v62 = vld [vmem:[%s2806_s20 + $0x220] sm:$0xff]  ;;  %v508_v63 = vld [vmem:[%s2806_s20 + $0x228] sm:$0xff] }
  0x83   : > { %1380 = vmatpush.msrb.mxu2 %v648_v8  ;;  %1493 = vmatpush.msrb.mxu3 %v680_v9  ;;  %v502_v37 = vld [vmem:[%s2806_s20 + $0x1f8] sm:$0xff] }
  0x84   : > { %1154 = vmatpush.msrb.mxu0 %v584_v10  ;;  %1267 = vmatpush.msrb.mxu1 %v616_v11  ;;  %v642_v48 = vld [vmem:[%s2816_s5 + $0x258] sm:$0xff]  ;;  %v511_v10 = vld [vmem:[%s2806_s20 + $0x240] sm:$0xff]  ;;  %v512_v11 = vld [vmem:[%s2806_s20 + $0x248] sm:$0xff] }
  0x85   : > { %1381 = vmatpush.msrb.mxu2 %v646_v20  ;;  %1494 = vmatpush.msrb.mxu3 %v678_v21  ;;  %v674_v49 = vld [vmem:[%s2816_s5 + $0x358] sm:$0xff]  ;;  %v3029_v20 = vld [vmem:[%s2806_s20 + $0x270] sm:$0xff] }
  0x86   : > { %946 = vmatmul.f32.gmra.mxu2 %v453_v28  ;;  %1059 = vmatmul.f32.gmra.mxu3 %v454_v29  ;;  %v497_v28 = vld [vmem:[%s2806_s20 + $0x1d0] sm:$0xff]  ;;  %v498_v29 = vld [vmem:[%s2806_s20 + $0x1d8] sm:$0xff] }
  0x87   : > { %1155 = vmatpush.msrb.mxu0 %v582_v22  ;;  %1268 = vmatpush.msrb.mxu1 %v614_v23  ;;  %v3032_v21 = vld [vmem:[%s2806_s20 + $0x278] sm:$0xff] }
  0x89   : > { %720 = vmatmul.f32.gmra.mxu0 %v451_v30  ;;  %833 = vmatmul.f32.gmra.mxu1 %v452_v31  ;;  %v495_v30 = vld [vmem:[%s2806_s20 + $0x1c0] sm:$0xff]  ;;  %v496_v31 = vld [vmem:[%s2806_s20 + $0x1c8] sm:$0xff] }
  0x8e   : > { %949 = vmatmul.f32.gmra.mxu2 %v457_v32  ;;  %1062 = vmatmul.f32.gmra.mxu3 %v458_v33  ;;  %v644_v32 = vld [vmem:[%s2816_s5 + $0x268] sm:$0xff] }
  0x8f   : > { %v676_v33 = vld [vmem:[%s2816_s5 + $0x368] sm:$0xff]  ;;  %1382 = vmatpush.msrb.mxu2 %v644_v32  ;;  %v3047_v32 = vld [vmem:[%s2806_s20 + $0x290] sm:$0xff] }
  0x90   : > { %1495 = vmatpush.msrb.mxu3 %v676_v33  ;;  %v3050_v33 = vld [vmem:[%s2806_s20 + $0x298] sm:$0xff] }
  0x91   : > { %723 = vmatmul.f32.gmra.mxu0 %v455_v34  ;;  %836 = vmatmul.f32.gmra.mxu1 %v456_v35  ;;  %v580_v34 = vld [vmem:[%s2816_s5 + $0x68] sm:$0xff] }
  0x92   : > { %v612_v35 = vld [vmem:[%s2816_s5 + $0x168] sm:$0xff]  ;;  %1156 = vmatpush.msrb.mxu0 %v580_v34  ;;  %1383 = vmatpush.msrb.mxu2 %v642_v48  ;;  %v3069_v48 = vld [vmem:[%s2806_s20 + $0x2b0] sm:$0xff] }
  0x93   : > { %1269 = vmatpush.msrb.mxu1 %v612_v35  ;;  %1496 = vmatpush.msrb.mxu3 %v674_v49  ;;  %v3072_v49 = vld [vmem:[%s2806_s20 + $0x2b8] sm:$0xff] }
  0x96   : > { %952 = vmatmul.f32.gmra.mxu2 %v461_v40  ;;  %1065 = vmatmul.f32.gmra.mxu3 %v462_v41  ;;  %v505_v40 = vld [vmem:[%s2806_s20 + $0x210] sm:$0xff]  ;;  %v506_v41 = vld [vmem:[%s2806_s20 + $0x218] sm:$0xff] }
  0x99   : > { %726 = vmatmul.f32.gmra.mxu0 %v459_v42  ;;  %839 = vmatmul.f32.gmra.mxu1 %v460_v43 }
  0x9e   : > { %955 = vmatmul.f32.gmra.mxu2 %v465_v44  ;;  %1068 = vmatmul.f32.gmra.mxu3 %v466_v45  ;;  %v503_v44 = vld [vmem:[%s2806_s20 + $0x200] sm:$0xff]  ;;  %v504_v45 = vld [vmem:[%s2806_s20 + $0x208] sm:$0xff] }
  0xa1   : > { %729 = vmatmul.f32.gmra.mxu0 %v463_v46  ;;  %842 = vmatmul.f32.gmra.mxu1 %v464_v47  ;;  %v1794_v47 = vld [vmem:[%s266_s11] sm:$0x3] }
  0xa6   : > { %958 = vmatmul.f32.gmra.mxu2 %v469_v52  ;;  %1071 = vmatmul.f32.gmra.mxu3 %v470_v53  ;;  %v3006_v53 = vperm.slane %v1794_v47, 0  ;;  %v606_v47 = vld [vmem:[%s2816_s5 + $0x138] sm:$0xff] }
  0xa9   : > { %732 = vmatmul.f32.gmra.mxu0 %v467_v54  ;;  %845 = vmatmul.f32.gmra.mxu1 %v468_v55  ;;  %v578_v54 = vld [vmem:[%s2816_s5 + $0x58] sm:$0xff] }
  0xaa   : > { %v610_v55 = vld [vmem:[%s2816_s5 + $0x158] sm:$0xff]  ;;  %1157 = vmatpush.msrb.mxu0 %v578_v54 }
  0xab   : > { %1270 = vmatpush.msrb.mxu1 %v610_v55  ;;  %v3078_v55 = vld [vmem:[%s2806_s20 + $0x2a0] sm:$0xff] }
  0xae   : > { %961 = vmatmul.f32.gmra.mxu2 %v473_v56  ;;  %1074 = vmatmul.f32.gmra.mxu3 %v474_v57  ;;  %v509_v56 = vld [vmem:[%s2806_s20 + $0x230] sm:$0xff]  ;;  %v510_v57 = vld [vmem:[%s2806_s20 + $0x238] sm:$0xff] }
  0xb1   : > { %735 = vmatmul.f32.gmra.mxu0 %v471_v58  ;;  %848 = vmatmul.f32.gmra.mxu1 %v472_v59 }
  0xb6   : > { %964 = vmatmul.f32.gmra.mxu2 %v477_v0  ;;  %1077 = vmatmul.f32.gmra.mxu3 %v478_v1 }
  0xb9   : > { %738 = vmatmul.f32.gmra.mxu0 %v475_v2  ;;  %851 = vmatmul.f32.gmra.mxu1 %v476_v3 }
  0xbe   : > { %967 = vmatmul.f32.gmra.mxu2 %v481_v4  ;;  %1080 = vmatmul.f32.gmra.mxu3 %v482_v5  ;;  %v513_v4 = vld [vmem:[%s2806_s20 + $0x250] sm:$0xff]  ;;  %v514_v5 = vld [vmem:[%s2806_s20 + $0x258] sm:$0xff] }
  0xc1   : > { %741 = vmatmul.f32.gmra.mxu0 %v479_v6  ;;  %854 = vmatmul.f32.gmra.mxu1 %v480_v7 }
  0xc6   : > { %970 = vmatmul.f32.gmra.mxu2 %v485_v12  ;;  %1083 = vmatmul.f32.gmra.mxu3 %v486_v13  ;;  %v640_v13 = vld [vmem:[%s2816_s5 + $0x248] sm:$0xff] }
  0xc7   : > { %1384 = vmatpush.msrb.mxu2 %v640_v13  ;;  %v3109_v13 = vld [vmem:[%s2806_s20 + $0x2f0] sm:$0xff] }
  0xc9   : > { %744 = vmatmul.f32.gmra.mxu0 %v483_v14  ;;  %857 = vmatmul.f32.gmra.mxu1 %v484_v15  ;;  %v672_v14 = vld [vmem:[%s2816_s5 + $0x348] sm:$0xff] }
  0xca   : > { %1497 = vmatpush.msrb.mxu3 %v672_v14  ;;  %v3112_v14 = vld [vmem:[%s2806_s20 + $0x2f8] sm:$0xff] }
  0xce   : > { %973 = vmatmul.f32.gmra.mxu2 %v489_v16  ;;  %1086 = vmatmul.f32.gmra.mxu3 %v490_v17 }
  0xd1   : > { %747 = vmatmul.f32.gmra.mxu0 %v487_v18  ;;  %860 = vmatmul.f32.gmra.mxu1 %v488_v19  ;;  %v576_v18 = vld [vmem:[%s2816_s5 + $0x48] sm:$0xff] }
  0xd2   : > { %v608_v19 = vld [vmem:[%s2816_s5 + $0x148] sm:$0xff]  ;;  %1158 = vmatpush.msrb.mxu0 %v576_v18 }
  0xd3   : > { %1271 = vmatpush.msrb.mxu1 %v608_v19  ;;  %v3118_v19 = vld [vmem:[%s2806_s20 + $0x2e0] sm:$0xff] }
  0xd5   : > { %1272 = vmatpush.msrb.mxu1 %v606_v47  ;;  %v570_v47 = vld [vmem:[%s2816_s5 + $0x18] sm:$0xff] }
  0xd6   : > { %976 = vmatmul.f32.gmra.mxu2 %v493_v24  ;;  %1089 = vmatmul.f32.gmra.mxu3 %v494_v25 }
  0xd9   : > { %750 = vmatmul.f32.gmra.mxu0 %v491_v26  ;;  %863 = vmatmul.f32.gmra.mxu1 %v492_v27  ;;  %v3038_v26 = vld [vmem:[%s2806_s20 + $0x260] sm:$0xff]  ;;  %v3041_v27 = vld [vmem:[%s2806_s20 + $0x268] sm:$0xff] }
  0xde   : > { %979 = vmatmul.f32.gmra.mxu2 %v497_v28  ;;  %1092 = vmatmul.f32.gmra.mxu3 %v498_v29 }
  0xe1   : > { %753 = vmatmul.f32.gmra.mxu0 %v495_v30  ;;  %866 = vmatmul.f32.gmra.mxu1 %v496_v31 }
  0xe6   : > { %982 = vmatmul.f32.gmra.mxu2 %v501_v36  ;;  %1095 = vmatmul.f32.gmra.mxu3 %v502_v37 }
  0xe9   : > { %756 = vmatmul.f32.gmra.mxu0 %v499_v38  ;;  %869 = vmatmul.f32.gmra.mxu1 %v500_v39  ;;  %v3056_v38 = vld [vmem:[%s2806_s20 + $0x280] sm:$0xff]  ;;  %v3059_v39 = vld [vmem:[%s2806_s20 + $0x288] sm:$0xff] }
  0xee   : > { %985 = vmatmul.f32.gmra.mxu2 %v505_v40  ;;  %v712_v42 = vpop.f32.mrf.mxu0  ;;  %v825_v43 = vpop.f32.mrf.mxu1  ;;  %1098 = vmatmul.f32.gmra.mxu3 %v506_v41  ;;  %v638_v41 = vld [vmem:[%s2816_s5 + $0x238] sm:$0xff] }
  0xef   : > { %v826_v46 = vadd.f32 %v825_v43, %v712_v42  ;;  %v670_v42 = vld [vmem:[%s2816_s5 + $0x338] sm:$0xff]  ;;  %1385 = vmatpush.msrb.mxu2 %v638_v41 }
  0xf0   : > { %1498 = vmatpush.msrb.mxu3 %v670_v42  ;;  %v634_v42 = vld [vmem:[%s2816_s5 + $0x218] sm:$0xff] }
  0xf1   : > { %v938_v50 = vpop.f32.mrf.mxu2  ;;  %759 = vmatmul.f32.gmra.mxu0 %v503_v44  ;;  %872 = vmatmul.f32.gmra.mxu1 %v504_v45  ;;  %v1051_v51 = vpop.f32.mrf.mxu3 }
  0xf2   : > { %v939_v52 = vadd.f32 %v938_v50, %v826_v46  ;;  %v574_v46 = vld [vmem:[%s2816_s5 + $0x38] sm:$0xff] }
  0xf3   : > { %1159 = vmatpush.msrb.mxu0 %v574_v46 }
  0xf4   : > { %v1052_v58 = vadd.f32 %v1051_v51, %v939_v52 }
  0xf6   : > { %v1800_v59 = vadd.f32 %v3006_v53, %v1052_v58  ;;  %988 = vmatmul.f32.gmra.mxu2 %v509_v56  ;;  %v715_v60 = vpop.f32.mrf.mxu0  ;;  %v828_v61 = vpop.f32.mrf.mxu1  ;;  %1101 = vmatmul.f32.gmra.mxu3 %v510_v57  ;;  %v3081_v56 = vld [vmem:[%s2806_s20 + $0x2a8] sm:$0xff] }
  0xf7   : > { %v829_v0 = vadd.f32 %v828_v61, %v715_v60  ;;  %v3087_v61 = vld [vmem:[%s2806_s20 + $0x2d0] sm:$0xff] }
  0xf8   : > { %1864 = vst [vmem:[%s3015_s6] sm:$0xff] %v1800_v59 }
  0xf9   : > { %v941_v1 = vpop.f32.mrf.mxu2  ;;  %762 = vmatmul.f32.gmra.mxu0 %v507_v62  ;;  %875 = vmatmul.f32.gmra.mxu1 %v508_v63  ;;  %v1054_v2 = vpop.f32.mrf.mxu3  ;;  %v3090_v62 = vld [vmem:[%s2806_s20 + $0x2d8] sm:$0xff] }
  0xfa   : > { %v942_v3 = vadd.f32 %v941_v1, %v829_v0 }
  0xfc   : > { %v1055_v6 = vadd.f32 %v1054_v2, %v942_v3  ;;  %v3096_v3 = vld [vmem:[%s2806_s20 + $0x2c0] sm:$0xff] }
  0xfe   : > { %v1802_v7 = vadd.f32 %v3006_v53, %v1055_v6  ;;  %991 = vmatmul.f32.gmra.mxu2 %v513_v4  ;;  %v718_v8 = vpop.f32.mrf.mxu0  ;;  %v831_v9 = vpop.f32.mrf.mxu1  ;;  %1104 = vmatmul.f32.gmra.mxu3 %v514_v5  ;;  %v3099_v4 = vld [vmem:[%s2806_s20 + $0x2c8] sm:$0xff] }
  0xff   : > { %v832_v12 = vadd.f32 %v831_v9, %v718_v8  ;;  %v636_v6 = vld [vmem:[%s2816_s5 + $0x228] sm:$0xff] }
 0x100   : > { %1866 = vst [vmem:[%s3015_s6 + $0x10] sm:$0xff] %v1802_v7  ;;  %v668_v7 = vld [vmem:[%s2816_s5 + $0x328] sm:$0xff]  ;;  %1386 = vmatpush.msrb.mxu2 %v636_v6  ;;  %v3167_v6 = vld [vmem:[%s2806_s20 + $0x350] sm:$0xff] }
 0x101   : > { %v944_v15 = vpop.f32.mrf.mxu2  ;;  %765 = vmatmul.f32.gmra.mxu0 %v511_v10  ;;  %878 = vmatmul.f32.gmra.mxu1 %v512_v11  ;;  %v1057_v16 = vpop.f32.mrf.mxu3  ;;  %v572_v11 = vld [vmem:[%s2816_s5 + $0x28] sm:$0xff] }
 0x102   : > { %v945_v17 = vadd.f32 %v944_v15, %v832_v12  ;;  %1499 = vmatpush.msrb.mxu3 %v668_v7  ;;  %v604_v12 = vld [vmem:[%s2816_s5 + $0x128] sm:$0xff]  ;;  %1160 = vmatpush.msrb.mxu0 %v572_v11  ;;  %v3170_v7 = vld [vmem:[%s2806_s20 + $0x358] sm:$0xff] }
 0x103   : > { %1273 = vmatpush.msrb.mxu1 %v604_v12  ;;  %1387 = vmatpush.msrb.mxu2 %v634_v42  ;;  %v3176_v12 = vld [vmem:[%s2806_s20 + $0x340] sm:$0xff] }
 0x104   : > { %v1058_v22 = vadd.f32 %v1057_v16, %v945_v17  ;;  %1161 = vmatpush.msrb.mxu0 %v570_v47 }
 0x106   : > { %v1804_v23 = vadd.f32 %v3006_v53, %v1058_v22  ;;  %994 = vmatmul.f32.gmra.mxu2 %v3029_v20  ;;  %v721_v24 = vpop.f32.mrf.mxu0  ;;  %v834_v25 = vpop.f32.mrf.mxu1  ;;  %1107 = vmatmul.f32.gmra.mxu3 %v3032_v21  ;;  %v3121_v22 = vld [vmem:[%s2806_s20 + $0x2e8] sm:$0xff] }
 0x107   : > { %v835_v28 = vadd.f32 %v834_v25, %v721_v24 }
 0x108   : > { %1868 = vst [vmem:[%s3015_s6 + $0x20] sm:$0xff] %v1804_v23 }
 0x109   : > { %v947_v29 = vpop.f32.mrf.mxu2  ;;  %768 = vmatmul.f32.gmra.mxu0 %v3038_v26  ;;  %881 = vmatmul.f32.gmra.mxu1 %v3041_v27  ;;  %v1060_v30 = vpop.f32.mrf.mxu3 }
 0x10a   : > { %v948_v31 = vadd.f32 %v947_v29, %v835_v28  ;;  %v3127_v29 = vld [vmem:[%s2806_s20 + $0x310] sm:$0xff] }
 0x10c   : > { %v1061_v34 = vadd.f32 %v1060_v30, %v948_v31  ;;  %v3130_v30 = vld [vmem:[%s2806_s20 + $0x318] sm:$0xff] }
 0x10e   : > { %v1806_v35 = vadd.f32 %v3006_v53, %v1061_v34  ;;  %997 = vmatmul.f32.gmra.mxu2 %v3047_v32  ;;  %v724_v36 = vpop.f32.mrf.mxu0  ;;  %v837_v37 = vpop.f32.mrf.mxu1  ;;  %1110 = vmatmul.f32.gmra.mxu3 %v3050_v33 }
 0x10f   : > { %v838_v40 = vadd.f32 %v837_v37, %v724_v36  ;;  %v3136_v37 = vld [vmem:[%s2806_s20 + $0x300] sm:$0xff] }
 0x110   : > { %1870 = vst [vmem:[%s3015_s6 + $0x30] sm:$0xff] %v1806_v35 }
 0x111   : > { %v950_v43 = vpop.f32.mrf.mxu2  ;;  %771 = vmatmul.f32.gmra.mxu0 %v3056_v38  ;;  %884 = vmatmul.f32.gmra.mxu1 %v3059_v39  ;;  %v1063_v44 = vpop.f32.mrf.mxu3 }
 0x112   : > { %v951_v45 = vadd.f32 %v950_v43, %v838_v40  ;;  %v3139_v40 = vld [vmem:[%s2806_s20 + $0x308] sm:$0xff]  ;;  %v666_v43 = vld [vmem:[%s2816_s5 + $0x318] sm:$0xff] }
 0x113   : > { %1500 = vmatpush.msrb.mxu3 %v666_v43 }
 0x114   : > { %v1064_v50 = vadd.f32 %v1063_v44, %v951_v45 }
 0x116   : > { %v1808_v51 = vadd.f32 %v3006_v53, %v1064_v50  ;;  %1000 = vmatmul.f32.gmra.mxu2 %v3069_v48  ;;  %v727_v52 = vpop.f32.mrf.mxu0  ;;  %v840_v54 = vpop.f32.mrf.mxu1  ;;  %1113 = vmatmul.f32.gmra.mxu3 %v3072_v49  ;;  %v602_v50 = vld [vmem:[%s2816_s5 + $0x118] sm:$0xff] }
 0x117   : > { %v841_v57 = vadd.f32 %v840_v54, %v727_v52  ;;  %v3152_v52 = vld [vmem:[%s2806_s20 + $0x338] sm:$0xff]  ;;  %1274 = vmatpush.msrb.mxu1 %v602_v50 }
 0x118   : > { %1872 = vst [vmem:[%s3015_s6 + $0x40] sm:$0xff] %v1808_v51  ;;  %v3149_v51 = vld [vmem:[%s2806_s20 + $0x330] sm:$0xff] }
 0x119   : > { %v953_v58 = vpop.f32.mrf.mxu2  ;;  %774 = vmatmul.f32.gmra.mxu0 %v3078_v55  ;;  %887 = vmatmul.f32.gmra.mxu1 %v3081_v56  ;;  %v1066_v59 = vpop.f32.mrf.mxu3 }
 0x11a   : > { %v954_v60 = vadd.f32 %v953_v58, %v841_v57 }
 0x11c   : > { %v1067_v63 = vadd.f32 %v1066_v59, %v954_v60  ;;  %v3158_v60 = vld [vmem:[%s2806_s20 + $0x320] sm:$0xff] }
 0x11e   : > { %v1810_v0 = vadd.f32 %v3006_v53, %v1067_v63  ;;  %1003 = vmatmul.f32.gmra.mxu2 %v3087_v61  ;;  %v730_v1 = vpop.f32.mrf.mxu0  ;;  %v843_v2 = vpop.f32.mrf.mxu1  ;;  %1116 = vmatmul.f32.gmra.mxu3 %v3090_v62  ;;  %v3161_v63 = vld [vmem:[%s2806_s20 + $0x328] sm:$0xff] }
 0x11f   : > { %v844_v5 = vadd.f32 %v843_v2, %v730_v1 }
 0x120   : > { %1874 = vst [vmem:[%s3015_s6 + $0x50] sm:$0xff] %v1810_v0 }
 0x121   : > { %v956_v8 = vpop.f32.mrf.mxu2  ;;  %777 = vmatmul.f32.gmra.mxu0 %v3096_v3  ;;  %890 = vmatmul.f32.gmra.mxu1 %v3099_v4  ;;  %v1069_v9 = vpop.f32.mrf.mxu3 }
 0x122   : > { %v957_v10 = vadd.f32 %v956_v8, %v844_v5 }
 0x124   : > { %v1070_v15 = vadd.f32 %v1069_v9, %v957_v10 }
 0x126   : > { %v1812_v16 = vadd.f32 %v3006_v53, %v1070_v15  ;;  %1006 = vmatmul.f32.gmra.mxu2 %v3109_v13  ;;  %v733_v17 = vpop.f32.mrf.mxu0  ;;  %v846_v18 = vpop.f32.mrf.mxu1  ;;  %1119 = vmatmul.f32.gmra.mxu3 %v3112_v14  ;;  %v3179_v15 = vld [vmem:[%s2806_s20 + $0x348] sm:$0xff] }
 0x127   : > { %v847_v23 = vadd.f32 %v846_v18, %v733_v17  ;;  %v632_v17 = vld [vmem:[%s2816_s5 + $0x208] sm:$0xff] }
 0x128   : > { %1876 = vst [vmem:[%s3015_s6 + $0x60] sm:$0xff] %v1812_v16  ;;  %v664_v18 = vld [vmem:[%s2816_s5 + $0x308] sm:$0xff]  ;;  %1388 = vmatpush.msrb.mxu2 %v632_v17  ;;  %v3225_v17 = vld [vmem:[%s2806_s20 + $0x3b0] sm:$0xff] }
 0x129   : > { %v959_v24 = vpop.f32.mrf.mxu2  ;;  %780 = vmatmul.f32.gmra.mxu0 %v3118_v19  ;;  %893 = vmatmul.f32.gmra.mxu1 %v3121_v22  ;;  %v1072_v25 = vpop.f32.mrf.mxu3 }
 0x12a   : > { %v960_v28 = vadd.f32 %v959_v24, %v847_v23  ;;  %1501 = vmatpush.msrb.mxu3 %v664_v18  ;;  %v3228_v18 = vld [vmem:[%s2806_s20 + $0x3b8] sm:$0xff] }
 0x12c   : > { %v1073_v31 = vadd.f32 %v1072_v25, %v960_v28  ;;  %v568_v28 = vld [vmem:[%s2816_s5 + $0x8] sm:$0xff] }
 0x12d   : > { %1162 = vmatpush.msrb.mxu0 %v568_v28 }
 0x12e   : > { %v1814_v34 = vadd.f32 %v3006_v53, %v1073_v31  ;;  %1009 = vmatmul.f32.gmra.mxu2 %v3127_v29  ;;  %v736_v35 = vpop.f32.mrf.mxu0  ;;  %v849_v36 = vpop.f32.mrf.mxu1  ;;  %1122 = vmatmul.f32.gmra.mxu3 %v3130_v30  ;;  %v600_v31 = vld [vmem:[%s2816_s5 + $0x108] sm:$0xff] }
 0x12f   : > { %v850_v41 = vadd.f32 %v849_v36, %v736_v35  ;;  %v3192_v35 = vld [vmem:[%s2806_s20 + $0x378] sm:$0xff]  ;;  %1275 = vmatpush.msrb.mxu1 %v600_v31  ;;  %v3234_v31 = vld [vmem:[%s2806_s20 + $0x3a0] sm:$0xff] }
 0x130   : > { %1878 = vst [vmem:[%s3015_s6 + $0x70] sm:$0xff] %v1814_v34  ;;  %v3189_v34 = vld [vmem:[%s2806_s20 + $0x370] sm:$0xff] }
 0x131   : > { %v962_v44 = vpop.f32.mrf.mxu2  ;;  %783 = vmatmul.f32.gmra.mxu0 %v3136_v37  ;;  %896 = vmatmul.f32.gmra.mxu1 %v3139_v40  ;;  %v1075_v45 = vpop.f32.mrf.mxu3 }
 0x132   : > { %v963_v46 = vadd.f32 %v962_v44, %v850_v41  ;;  %v3198_v44 = vld [vmem:[%s2806_s20 + $0x360] sm:$0xff] }
 0x134   : > { %v1076_v54 = vadd.f32 %v1075_v45, %v963_v46  ;;  %v3201_v45 = vld [vmem:[%s2806_s20 + $0x368] sm:$0xff] }
 0x136   : > { %v1816_v57 = vadd.f32 %v3006_v53, %v1076_v54  ;;  %1012 = vmatmul.f32.gmra.mxu2 %v3149_v51  ;;  %v739_v58 = vpop.f32.mrf.mxu0  ;;  %v852_v59 = vpop.f32.mrf.mxu1  ;;  %1125 = vmatmul.f32.gmra.mxu3 %v3152_v52 }
 0x137   : > { %v853_v0 = vadd.f32 %v852_v59, %v739_v58  ;;  %v3210_v58 = vld [vmem:[%s2806_s20 + $0x398] sm:$0xff] }
 0x138   : > { %1880 = vst [vmem:[%s3015_s6 + $0x80] sm:$0xff] %v1816_v57  ;;  %v3207_v57 = vld [vmem:[%s2806_s20 + $0x390] sm:$0xff] }
 0x139   : > { %v965_v1 = vpop.f32.mrf.mxu2  ;;  %786 = vmatmul.f32.gmra.mxu0 %v3158_v60  ;;  %899 = vmatmul.f32.gmra.mxu1 %v3161_v63  ;;  %v1078_v2 = vpop.f32.mrf.mxu3 }
 0x13a   : > { %v966_v5 = vadd.f32 %v965_v1, %v853_v0 }
 0x13c   : > { %v1079_v8 = vadd.f32 %v1078_v2, %v966_v5  ;;  %v3216_v5 = vld [vmem:[%s2806_s20 + $0x380] sm:$0xff] }
 0x13e   : > { %v1818_v9 = vadd.f32 %v3006_v53, %v1079_v8  ;;  %1015 = vmatmul.f32.gmra.mxu2 %v3167_v6  ;;  %v742_v10 = vpop.f32.mrf.mxu0  ;;  %v855_v11 = vpop.f32.mrf.mxu1  ;;  %1128 = vmatmul.f32.gmra.mxu3 %v3170_v7  ;;  %v3219_v8 = vld [vmem:[%s2806_s20 + $0x388] sm:$0xff] }
 0x13f   : > { %v856_v16 = vadd.f32 %v855_v11, %v742_v10 }
 0x140   : > { %1882 = vst [vmem:[%s3015_s6 + $0x90] sm:$0xff] %v1818_v9 }
 0x141   : > { %v968_v23 = vpop.f32.mrf.mxu2  ;;  %789 = vmatmul.f32.gmra.mxu0 %v3176_v12  ;;  %902 = vmatmul.f32.gmra.mxu1 %v3179_v15  ;;  %v1081_v24 = vpop.f32.mrf.mxu3 }
 0x142   : > { %v969_v25 = vadd.f32 %v968_v23, %v856_v16 }
 0x144   : > { %v1082_v36 = vadd.f32 %v1081_v24, %v969_v25 }
 0x146   : > { %v1820_v41 = vadd.f32 %v3006_v53, %v1082_v36  ;;  %1018 = vmatmul.f32.gmra.mxu2 %v3189_v34  ;;  %v745_v42 = vpop.f32.mrf.mxu0  ;;  %v858_v43 = vpop.f32.mrf.mxu1  ;;  %1131 = vmatmul.f32.gmra.mxu3 %v3192_v35  ;;  %v3237_v36 = vld [vmem:[%s2806_s20 + $0x3a8] sm:$0xff] }
 0x147   : > { %v859_v46 = vadd.f32 %v858_v43, %v745_v42 }
 0x148   : > { %1884 = vst [vmem:[%s3015_s6 + $0xa0] sm:$0xff] %v1820_v41 }
 0x149   : > { %v971_v47 = vpop.f32.mrf.mxu2  ;;  %792 = vmatmul.f32.gmra.mxu0 %v3198_v44  ;;  %905 = vmatmul.f32.gmra.mxu1 %v3201_v45  ;;  %v1084_v50 = vpop.f32.mrf.mxu3 }
 0x14a   : > { %v972_v54 = vadd.f32 %v971_v47, %v859_v46  ;;  %v3243_v47 = vld [vmem:[%s2806_s20 + $0x3d0] sm:$0xff] }
 0x14c   : > { %v1085_v59 = vadd.f32 %v1084_v50, %v972_v54  ;;  %v3246_v50 = vld [vmem:[%s2806_s20 + $0x3d8] sm:$0xff] }
 0x14e   : > { %v1822_v0 = vadd.f32 %v3006_v53, %v1085_v59  ;;  %1021 = vmatmul.f32.gmra.mxu2 %v3207_v57  ;;  %v748_v1 = vpop.f32.mrf.mxu0  ;;  %v861_v2 = vpop.f32.mrf.mxu1  ;;  %1134 = vmatmul.f32.gmra.mxu3 %v3210_v58 }
 0x14f   : > { %v862_v9 = vadd.f32 %v861_v2, %v748_v1  ;;  %v3252_v2 = vld [vmem:[%s2806_s20 + $0x3c0] sm:$0xff] }
 0x150   : > { %1886 = vst [vmem:[%s3015_s6 + $0xb0] sm:$0xff] %v1822_v0 }
 0x151   : > { %v974_v10 = vpop.f32.mrf.mxu2  ;;  %795 = vmatmul.f32.gmra.mxu0 %v3216_v5  ;;  %908 = vmatmul.f32.gmra.mxu1 %v3219_v8  ;;  %v1087_v11 = vpop.f32.mrf.mxu3 }
 0x152   : > { %v975_v16 = vadd.f32 %v974_v10, %v862_v9  ;;  %v3255_v9 = vld [vmem:[%s2806_s20 + $0x3c8] sm:$0xff] }
 0x153   : > { %3625 = vst [vmem:[#allocation25_spill] sm:$0xff] %v3255_v9 }
 0x154   : > { %v1088_v23 = vadd.f32 %v1087_v11, %v975_v16 }
 0x156   : > { %v1824_v24 = vadd.f32 %v3006_v53, %v1088_v23  ;;  %1024 = vmatmul.f32.gmra.mxu2 %v3225_v17  ;;  %v751_v25 = vpop.f32.mrf.mxu0  ;;  %v864_v28 = vpop.f32.mrf.mxu1  ;;  %1137 = vmatmul.f32.gmra.mxu3 %v3228_v18 }
 0x157   : > { %v865_v41 = vadd.f32 %v864_v28, %v751_v25  ;;  %v3264_v25 = vld [vmem:[%s2806_s20 + $0x3f8] sm:$0xff] }
 0x158   : > { %1888 = vst [vmem:[%s3015_s6 + $0xc0] sm:$0xff] %v1824_v24  ;;  %v3261_v24 = vld [vmem:[%s2806_s20 + $0x3f0] sm:$0xff] }
 0x159   : > { %v977_v42 = vpop.f32.mrf.mxu2  ;;  %798 = vmatmul.f32.gmra.mxu0 %v3234_v31  ;;  %911 = vmatmul.f32.gmra.mxu1 %v3237_v36  ;;  %v1090_v43 = vpop.f32.mrf.mxu3  ;;  %3626 = vst [vmem:[#allocation26_spill] sm:$0xff] %v3261_v24 }
 0x15a   : > { %v978_v46 = vadd.f32 %v977_v42, %v865_v41  ;;  %3627 = vst [vmem:[#allocation27_spill] sm:$0xff] %v3264_v25 }
 0x15c   : > { %v1091_v54 = vadd.f32 %v1090_v43, %v978_v46  ;;  %v3270_v46 = vld [vmem:[%s2806_s20 + $0x3e0] sm:$0xff] }
 0x15d   : > { %3628 = vst [vmem:[#allocation28_spill] sm:$0xff] %v3270_v46 }
 0x15e   : > { %v1826_v59 = vadd.f32 %v3006_v53, %v1091_v54  ;;  %1027 = vmatmul.f32.gmra.mxu2 %v3243_v47  ;;  %v754_v0 = vpop.f32.mrf.mxu0  ;;  %v867_v1 = vpop.f32.mrf.mxu1  ;;  %1140 = vmatmul.f32.gmra.mxu3 %v3246_v50  ;;  %v3273_v54 = vld [vmem:[%s2806_s20 + $0x3e8] sm:$0xff] }
 0x15f   : > { %v868_v10 = vadd.f32 %v867_v1, %v754_v0  ;;  %3629 = vst [vmem:[#allocation29_spill] sm:$0xff] %v3273_v54 }
 0x160   : > { %1890 = vst [vmem:[%s3015_s6 + $0xd0] sm:$0xff] %v1826_v59 }
 0x161   : > { %v980_v11 = vpop.f32.mrf.mxu2  ;;  %801 = vmatmul.f32.gmra.mxu0 %v3252_v2  ;;  %914 = vmatmul.f32.gmra.mxu1 %v3255_v9  ;;  %v1093_v16 = vpop.f32.mrf.mxu3 }
 0x162   : > { %v981_v23 = vadd.f32 %v980_v11, %v868_v10 }
 0x164   : > { %v1094_v28 = vadd.f32 %v1093_v16, %v981_v23  ;;  %v2259_v23 = vld [vmem:[%s2806_s20 + $0x10] sm:$0xff] }
 0x166   : > { %v1828_v41 = vadd.f32 %v3006_v53, %v1094_v28  ;;  %1030 = vmatmul.f32.gmra.mxu2 %v3261_v24  ;;  %v757_v42 = vpop.f32.mrf.mxu0  ;;  %v870_v43 = vpop.f32.mrf.mxu1  ;;  %1143 = vmatmul.f32.gmra.mxu3 %v3264_v25  ;;  %v2333_v24 = vld [vmem:[%s2806_s20 + $0x258] sm:$0xff] }
 0x167   : > { %v871_v59 = vadd.f32 %v870_v43, %v757_v42  ;;  %v2260_v42 = vld [vmem:[%s2806_s20 + $0x18] sm:$0xff] }
 0x168   : > { %1892 = vst [vmem:[%s3015_s6 + $0xe0] sm:$0xff] %v1828_v41 }
 0x169   : > { %v983_v0 = vpop.f32.mrf.mxu2  ;;  %804 = vmatmul.f32.gmra.mxu0 %v3270_v46  ;;  %917 = vmatmul.f32.gmra.mxu1 %v3273_v54  ;;  %v1096_v1 = vpop.f32.mrf.mxu3  ;;  %v2261_v46 = vld [vmem:[%s2806_s20] sm:$0xff]  ;;  %v2262_v54 = vld [vmem:[%s2806_s20 + $0x8] sm:$0xff] }
 0x16a   : > { %v984_v10 = vadd.f32 %v983_v0, %v871_v59 }
 0x16c   : > { %v1097_v11 = vadd.f32 %v1096_v1, %v984_v10 }
 0x16e   : > { %v1830_v16 = vadd.f32 %v3006_v53, %v1097_v11  ;;  %1389 = vmatmul.f32.vlgmr.msrb.gmra.mxu2 %v2259_v23  ;;  %v760_v28 = vpop.f32.mrf.mxu0  ;;  %v873_v25 = vpop.f32.mrf.mxu1  ;;  %1502 = vmatmul.f32.vlgmr.msrb.gmra.mxu3 %v2260_v42  ;;  %v2263_v11 = vld [vmem:[%s2806_s20 + $0x30] sm:$0xff] }
 0x16f   : > { %v874_v41 = vadd.f32 %v873_v25, %v760_v28  ;;  %v2264_v25 = vld [vmem:[%s2806_s20 + $0x38] sm:$0xff]  ;;  %v2265_v28 = vld [vmem:[%s2806_s20 + $0x20] sm:$0xff] }
 0x170   : > { %1894 = vst [vmem:[%s3015_s6 + $0xf0] sm:$0xff] %v1830_v16 }
 0x171   : > { %v986_v43 = vpop.f32.mrf.mxu2  ;;  %1163 = vmatmul.f32.vlgmr.msrb.gmra.mxu0 %v2261_v46  ;;  %1276 = vmatmul.f32.vlgmr.msrb.gmra.mxu1 %v2262_v54  ;;  %v1099_v59 = vpop.f32.mrf.mxu3  ;;  %v2266_v54 = vld [vmem:[%s2806_s20 + $0x28] sm:$0xff] }
 0x172   : > { %v987_v0 = vadd.f32 %v986_v43, %v874_v41 }
 0x174   : > { %v1100_v1 = vadd.f32 %v1099_v59, %v987_v0 }
 0x176   : > { %v1832_v10 = vadd.f32 %v3006_v53, %v1100_v1  ;;  %1392 = vmatmul.f32.gmra.mxu2 %v2263_v11  ;;  %v763_v23 = vpop.f32.mrf.mxu0  ;;  %v876_v42 = vpop.f32.mrf.mxu1  ;;  %1505 = vmatmul.f32.gmra.mxu3 %v2264_v25  ;;  %v2267_v1 = vld [vmem:[%s2806_s20 + $0x50] sm:$0xff] }
 0x177   : > { %v877_v16 = vadd.f32 %v876_v42, %v763_v23  ;;  %v2268_v23 = vld [vmem:[%s2806_s20 + $0x58] sm:$0xff] }
 0x178   : > { %1896 = vst [vmem:[%s3015_s6 + $0x100] sm:$0xff] %v1832_v10 }
 0x179   : > { %v989_v46 = vpop.f32.mrf.mxu2  ;;  %1166 = vmatmul.f32.gmra.mxu0 %v2265_v28  ;;  %1279 = vmatmul.f32.gmra.mxu1 %v2266_v54  ;;  %v1102_v41 = vpop.f32.mrf.mxu3  ;;  %v2269_v28 = vld [vmem:[%s2806_s20 + $0x40] sm:$0xff]  ;;  %v2270_v54 = vld [vmem:[%s2806_s20 + $0x48] sm:$0xff] }
 0x17a   : > { %v990_v43 = vadd.f32 %v989_v46, %v877_v16 }
 0x17c   : > { %v1103_v59 = vadd.f32 %v1102_v41, %v990_v43 }
 0x17e   : > { %v1834_v0 = vadd.f32 %v3006_v53, %v1103_v59  ;;  %1395 = vmatmul.f32.gmra.mxu2 %v2267_v1  ;;  %v766_v11 = vpop.f32.mrf.mxu0  ;;  %v879_v25 = vpop.f32.mrf.mxu1  ;;  %1508 = vmatmul.f32.gmra.mxu3 %v2268_v23  ;;  %v2271_v59 = vld [vmem:[%s2806_s20 + $0x70] sm:$0xff] }
 0x17f   : > { %v880_v10 = vadd.f32 %v879_v25, %v766_v11  ;;  %v2272_v11 = vld [vmem:[%s2806_s20 + $0x78] sm:$0xff] }
 0x180   : > { %1898 = vst [vmem:[%s3015_s6 + $0x110] sm:$0xff] %v1834_v0 }
 0x181   : > { %v992_v42 = vpop.f32.mrf.mxu2  ;;  %1169 = vmatmul.f32.gmra.mxu0 %v2269_v28  ;;  %1282 = vmatmul.f32.gmra.mxu1 %v2270_v54  ;;  %v1105_v16 = vpop.f32.mrf.mxu3  ;;  %v2273_v28 = vld [vmem:[%s2806_s20 + $0x60] sm:$0xff]  ;;  %v2274_v54 = vld [vmem:[%s2806_s20 + $0x68] sm:$0xff] }
 0x182   : > { %v993_v46 = vadd.f32 %v992_v42, %v880_v10 }
 0x184   : > { %v1106_v41 = vadd.f32 %v1105_v16, %v993_v46 }
 0x186   : > { %v1836_v43 = vadd.f32 %v3006_v53, %v1106_v41  ;;  %1398 = vmatmul.f32.gmra.mxu2 %v2271_v59  ;;  %v769_v1 = vpop.f32.mrf.mxu0  ;;  %v882_v23 = vpop.f32.mrf.mxu1  ;;  %1511 = vmatmul.f32.gmra.mxu3 %v2272_v11  ;;  %v2275_v41 = vld [vmem:[%s2806_s20 + $0x90] sm:$0xff] }
 0x187   : > { %v883_v0 = vadd.f32 %v882_v23, %v769_v1  ;;  %v2276_v1 = vld [vmem:[%s2806_s20 + $0x98] sm:$0xff] }
 0x188   : > { %1900 = vst [vmem:[%s3015_s6 + $0x120] sm:$0xff] %v1836_v43 }
 0x189   : > { %v995_v25 = vpop.f32.mrf.mxu2  ;;  %1172 = vmatmul.f32.gmra.mxu0 %v2273_v28  ;;  %1285 = vmatmul.f32.gmra.mxu1 %v2274_v54  ;;  %v1108_v10 = vpop.f32.mrf.mxu3  ;;  %v2277_v28 = vld [vmem:[%s2806_s20 + $0x80] sm:$0xff]  ;;  %v2278_v54 = vld [vmem:[%s2806_s20 + $0x88] sm:$0xff] }
 0x18a   : > { %v996_v42 = vadd.f32 %v995_v25, %v883_v0 }
 0x18c   : > { %v1109_v16 = vadd.f32 %v1108_v10, %v996_v42 }
 0x18e   : > { %v1838_v46 = vadd.f32 %v3006_v53, %v1109_v16  ;;  %1401 = vmatmul.f32.gmra.mxu2 %v2275_v41  ;;  %v772_v59 = vpop.f32.mrf.mxu0  ;;  %v885_v11 = vpop.f32.mrf.mxu1  ;;  %1514 = vmatmul.f32.gmra.mxu3 %v2276_v1  ;;  %v2279_v16 = vld [vmem:[%s2806_s20 + $0xb0] sm:$0xff] }
 0x18f   : > { %v886_v43 = vadd.f32 %v885_v11, %v772_v59  ;;  %v2280_v59 = vld [vmem:[%s2806_s20 + $0xb8] sm:$0xff] }
 0x190   : > { %1902 = vst [vmem:[%s3015_s6 + $0x130] sm:$0xff] %v1838_v46 }
 0x191   : > { %v998_v23 = vpop.f32.mrf.mxu2  ;;  %1175 = vmatmul.f32.gmra.mxu0 %v2277_v28  ;;  %1288 = vmatmul.f32.gmra.mxu1 %v2278_v54  ;;  %v1111_v0 = vpop.f32.mrf.mxu3  ;;  %v2281_v28 = vld [vmem:[%s2806_s20 + $0xa0] sm:$0xff]  ;;  %v2282_v54 = vld [vmem:[%s2806_s20 + $0xa8] sm:$0xff] }
 0x192   : > { %v999_v25 = vadd.f32 %v998_v23, %v886_v43 }
 0x194   : > { %v1112_v10 = vadd.f32 %v1111_v0, %v999_v25 }
 0x196   : > { %v1840_v42 = vadd.f32 %v3006_v53, %v1112_v10  ;;  %1404 = vmatmul.f32.gmra.mxu2 %v2279_v16  ;;  %v775_v41 = vpop.f32.mrf.mxu0  ;;  %v888_v1 = vpop.f32.mrf.mxu1  ;;  %1517 = vmatmul.f32.gmra.mxu3 %v2280_v59  ;;  %v2283_v10 = vld [vmem:[%s2806_s20 + $0xd0] sm:$0xff] }
 0x197   : > { %v889_v46 = vadd.f32 %v888_v1, %v775_v41  ;;  %v2284_v41 = vld [vmem:[%s2806_s20 + $0xd8] sm:$0xff] }
 0x198   : > { %1904 = vst [vmem:[%s3015_s6 + $0x140] sm:$0xff] %v1840_v42 }
 0x199   : > { %v1001_v11 = vpop.f32.mrf.mxu2  ;;  %1178 = vmatmul.f32.gmra.mxu0 %v2281_v28  ;;  %1291 = vmatmul.f32.gmra.mxu1 %v2282_v54  ;;  %v1114_v43 = vpop.f32.mrf.mxu3  ;;  %v2285_v28 = vld [vmem:[%s2806_s20 + $0xc0] sm:$0xff]  ;;  %v2286_v54 = vld [vmem:[%s2806_s20 + $0xc8] sm:$0xff] }
 0x19a   : > { %v1002_v23 = vadd.f32 %v1001_v11, %v889_v46 }
 0x19c   : > { %v1115_v0 = vadd.f32 %v1114_v43, %v1002_v23 }
 0x19e   : > { %v1842_v25 = vadd.f32 %v3006_v53, %v1115_v0  ;;  %1407 = vmatmul.f32.gmra.mxu2 %v2283_v10  ;;  %v778_v16 = vpop.f32.mrf.mxu0  ;;  %v891_v59 = vpop.f32.mrf.mxu1  ;;  %1520 = vmatmul.f32.gmra.mxu3 %v2284_v41  ;;  %v2287_v0 = vld [vmem:[%s2806_s20 + $0xf0] sm:$0xff] }
 0x19f   : > { %v892_v42 = vadd.f32 %v891_v59, %v778_v16  ;;  %v2288_v16 = vld [vmem:[%s2806_s20 + $0xf8] sm:$0xff] }
 0x1a0   : > { %1906 = vst [vmem:[%s3015_s6 + $0x150] sm:$0xff] %v1842_v25 }
 0x1a1   : > { %v1004_v1 = vpop.f32.mrf.mxu2  ;;  %1181 = vmatmul.f32.gmra.mxu0 %v2285_v28  ;;  %1294 = vmatmul.f32.gmra.mxu1 %v2286_v54  ;;  %v1117_v46 = vpop.f32.mrf.mxu3  ;;  %v2289_v28 = vld [vmem:[%s2806_s20 + $0xe0] sm:$0xff]  ;;  %v2290_v54 = vld [vmem:[%s2806_s20 + $0xe8] sm:$0xff] }
 0x1a2   : > { %v1005_v11 = vadd.f32 %v1004_v1, %v892_v42 }
 0x1a4   : > { %v1118_v43 = vadd.f32 %v1117_v46, %v1005_v11 }
 0x1a6   : > { %v1844_v23 = vadd.f32 %v3006_v53, %v1118_v43  ;;  %1410 = vmatmul.f32.gmra.mxu2 %v2287_v0  ;;  %v781_v10 = vpop.f32.mrf.mxu0  ;;  %v894_v41 = vpop.f32.mrf.mxu1  ;;  %1523 = vmatmul.f32.gmra.mxu3 %v2288_v16  ;;  %v2291_v43 = vld [vmem:[%s2806_s20 + $0x110] sm:$0xff] }
 0x1a7   : > { %v895_v25 = vadd.f32 %v894_v41, %v781_v10  ;;  %v2292_v10 = vld [vmem:[%s2806_s20 + $0x118] sm:$0xff] }
 0x1a8   : > { %1908 = vst [vmem:[%s3015_s6 + $0x160] sm:$0xff] %v1844_v23 }
 0x1a9   : > { %v1007_v59 = vpop.f32.mrf.mxu2  ;;  %1184 = vmatmul.f32.gmra.mxu0 %v2289_v28  ;;  %1297 = vmatmul.f32.gmra.mxu1 %v2290_v54  ;;  %v1120_v42 = vpop.f32.mrf.mxu3  ;;  %v2293_v28 = vld [vmem:[%s2806_s20 + $0x100] sm:$0xff]  ;;  %v2294_v54 = vld [vmem:[%s2806_s20 + $0x108] sm:$0xff] }
 0x1aa   : > { %v1008_v1 = vadd.f32 %v1007_v59, %v895_v25 }
 0x1ac   : > { %v1121_v46 = vadd.f32 %v1120_v42, %v1008_v1 }
 0x1ae   : > { %v1846_v11 = vadd.f32 %v3006_v53, %v1121_v46  ;;  %1413 = vmatmul.f32.gmra.mxu2 %v2291_v43  ;;  %v784_v0 = vpop.f32.mrf.mxu0  ;;  %v897_v16 = vpop.f32.mrf.mxu1  ;;  %1526 = vmatmul.f32.gmra.mxu3 %v2292_v10  ;;  %v2295_v46 = vld [vmem:[%s2806_s20 + $0x130] sm:$0xff] }
 0x1af   : > { %v898_v23 = vadd.f32 %v897_v16, %v784_v0  ;;  %v2296_v0 = vld [vmem:[%s2806_s20 + $0x138] sm:$0xff] }
 0x1b0   : > { %1910 = vst [vmem:[%s3015_s6 + $0x170] sm:$0xff] %v1846_v11 }
 0x1b1   : > { %v1010_v41 = vpop.f32.mrf.mxu2  ;;  %1187 = vmatmul.f32.gmra.mxu0 %v2293_v28  ;;  %1300 = vmatmul.f32.gmra.mxu1 %v2294_v54  ;;  %v1123_v25 = vpop.f32.mrf.mxu3  ;;  %v2297_v28 = vld [vmem:[%s2806_s20 + $0x120] sm:$0xff]  ;;  %v2298_v54 = vld [vmem:[%s2806_s20 + $0x128] sm:$0xff] }
 0x1b2   : > { %v1011_v59 = vadd.f32 %v1010_v41, %v898_v23 }
 0x1b4   : > { %v1124_v42 = vadd.f32 %v1123_v25, %v1011_v59 }
 0x1b6   : > { %v1848_v1 = vadd.f32 %v3006_v53, %v1124_v42  ;;  %1416 = vmatmul.f32.gmra.mxu2 %v2295_v46  ;;  %v787_v43 = vpop.f32.mrf.mxu0  ;;  %v900_v10 = vpop.f32.mrf.mxu1  ;;  %1529 = vmatmul.f32.gmra.mxu3 %v2296_v0  ;;  %v2299_v42 = vld [vmem:[%s2806_s20 + $0x150] sm:$0xff] }
 0x1b7   : > { %v901_v11 = vadd.f32 %v900_v10, %v787_v43  ;;  %v2300_v43 = vld [vmem:[%s2806_s20 + $0x158] sm:$0xff] }
 0x1b8   : > { %1912 = vst [vmem:[%s3015_s6 + $0x180] sm:$0xff] %v1848_v1 }
 0x1b9   : > { %v1013_v16 = vpop.f32.mrf.mxu2  ;;  %1190 = vmatmul.f32.gmra.mxu0 %v2297_v28  ;;  %1303 = vmatmul.f32.gmra.mxu1 %v2298_v54  ;;  %v1126_v23 = vpop.f32.mrf.mxu3  ;;  %v2301_v28 = vld [vmem:[%s2806_s20 + $0x140] sm:$0xff]  ;;  %v2302_v54 = vld [vmem:[%s2806_s20 + $0x148] sm:$0xff] }
 0x1ba   : > { %v1014_v41 = vadd.f32 %v1013_v16, %v901_v11 }
 0x1bc   : > { %v1127_v25 = vadd.f32 %v1126_v23, %v1014_v41 }
 0x1be   : > { %v1850_v59 = vadd.f32 %v3006_v53, %v1127_v25  ;;  %1419 = vmatmul.f32.gmra.mxu2 %v2299_v42  ;;  %v790_v46 = vpop.f32.mrf.mxu0  ;;  %v903_v0 = vpop.f32.mrf.mxu1  ;;  %1532 = vmatmul.f32.gmra.mxu3 %v2300_v43  ;;  %v2303_v25 = vld [vmem:[%s2806_s20 + $0x170] sm:$0xff] }
 0x1bf   : > { %v904_v1 = vadd.f32 %v903_v0, %v790_v46  ;;  %v2304_v46 = vld [vmem:[%s2806_s20 + $0x178] sm:$0xff] }
 0x1c0   : > { %1914 = vst [vmem:[%s3015_s6 + $0x190] sm:$0xff] %v1850_v59 }
 0x1c1   : > { %v1016_v10 = vpop.f32.mrf.mxu2  ;;  %1193 = vmatmul.f32.gmra.mxu0 %v2301_v28  ;;  %1306 = vmatmul.f32.gmra.mxu1 %v2302_v54  ;;  %v1129_v11 = vpop.f32.mrf.mxu3  ;;  %v2305_v28 = vld [vmem:[%s2806_s20 + $0x160] sm:$0xff]  ;;  %v2306_v54 = vld [vmem:[%s2806_s20 + $0x168] sm:$0xff] }
 0x1c2   : > { %v1017_v16 = vadd.f32 %v1016_v10, %v904_v1 }
 0x1c4   : > { %v1130_v23 = vadd.f32 %v1129_v11, %v1017_v16 }
 0x1c6   : > { %v1852_v41 = vadd.f32 %v3006_v53, %v1130_v23  ;;  %1422 = vmatmul.f32.gmra.mxu2 %v2303_v25  ;;  %v793_v42 = vpop.f32.mrf.mxu0  ;;  %v906_v43 = vpop.f32.mrf.mxu1  ;;  %1535 = vmatmul.f32.gmra.mxu3 %v2304_v46  ;;  %v2307_v23 = vld [vmem:[%s2806_s20 + $0x190] sm:$0xff] }
 0x1c7   : > { %v907_v59 = vadd.f32 %v906_v43, %v793_v42  ;;  %v2308_v42 = vld [vmem:[%s2806_s20 + $0x198] sm:$0xff] }
 0x1c8   : > { %1916 = vst [vmem:[%s3015_s6 + $0x1a0] sm:$0xff] %v1852_v41 }
 0x1c9   : > { %v1019_v0 = vpop.f32.mrf.mxu2  ;;  %1196 = vmatmul.f32.gmra.mxu0 %v2305_v28  ;;  %1309 = vmatmul.f32.gmra.mxu1 %v2306_v54  ;;  %v1132_v1 = vpop.f32.mrf.mxu3  ;;  %v2309_v28 = vld [vmem:[%s2806_s20 + $0x180] sm:$0xff]  ;;  %v2310_v54 = vld [vmem:[%s2806_s20 + $0x188] sm:$0xff] }
 0x1ca   : > { %v1020_v10 = vadd.f32 %v1019_v0, %v907_v59 }
 0x1cc   : > { %v1133_v11 = vadd.f32 %v1132_v1, %v1020_v10 }
 0x1ce   : > { %v1854_v16 = vadd.f32 %v3006_v53, %v1133_v11  ;;  %1425 = vmatmul.f32.gmra.mxu2 %v2307_v23  ;;  %v796_v25 = vpop.f32.mrf.mxu0  ;;  %v909_v46 = vpop.f32.mrf.mxu1  ;;  %1538 = vmatmul.f32.gmra.mxu3 %v2308_v42  ;;  %v2311_v11 = vld [vmem:[%s2806_s20 + $0x1b0] sm:$0xff] }
 0x1cf   : > { %v910_v41 = vadd.f32 %v909_v46, %v796_v25  ;;  %v2312_v25 = vld [vmem:[%s2806_s20 + $0x1b8] sm:$0xff] }
 0x1d0   : > { %1918 = vst [vmem:[%s3015_s6 + $0x1b0] sm:$0xff] %v1854_v16 }
 0x1d1   : > { %v1022_v43 = vpop.f32.mrf.mxu2  ;;  %1199 = vmatmul.f32.gmra.mxu0 %v2309_v28  ;;  %1312 = vmatmul.f32.gmra.mxu1 %v2310_v54  ;;  %v1135_v59 = vpop.f32.mrf.mxu3  ;;  %v2313_v28 = vld [vmem:[%s2806_s20 + $0x1a0] sm:$0xff]  ;;  %v2314_v54 = vld [vmem:[%s2806_s20 + $0x1a8] sm:$0xff] }
 0x1d2   : > { %v1023_v0 = vadd.f32 %v1022_v43, %v910_v41 }
 0x1d4   : > { %v1136_v1 = vadd.f32 %v1135_v59, %v1023_v0 }
 0x1d6   : > { %v1856_v10 = vadd.f32 %v3006_v53, %v1136_v1  ;;  %1428 = vmatmul.f32.gmra.mxu2 %v2311_v11  ;;  %v799_v23 = vpop.f32.mrf.mxu0  ;;  %v912_v42 = vpop.f32.mrf.mxu1  ;;  %1541 = vmatmul.f32.gmra.mxu3 %v2312_v25  ;;  %v2315_v1 = vld [vmem:[%s2806_s20 + $0x1d0] sm:$0xff] }
 0x1d7   : > { %v913_v16 = vadd.f32 %v912_v42, %v799_v23  ;;  %v2316_v23 = vld [vmem:[%s2806_s20 + $0x1d8] sm:$0xff] }
 0x1d8   : > { %1920 = vst [vmem:[%s3015_s6 + $0x1c0] sm:$0xff] %v1856_v10 }
 0x1d9   : > { %v1025_v46 = vpop.f32.mrf.mxu2  ;;  %1202 = vmatmul.f32.gmra.mxu0 %v2313_v28  ;;  %1315 = vmatmul.f32.gmra.mxu1 %v2314_v54  ;;  %v1138_v41 = vpop.f32.mrf.mxu3  ;;  %v2317_v28 = vld [vmem:[%s2806_s20 + $0x1c0] sm:$0xff]  ;;  %v2318_v54 = vld [vmem:[%s2806_s20 + $0x1c8] sm:$0xff] }
 0x1da   : > { %v1026_v43 = vadd.f32 %v1025_v46, %v913_v16 }
 0x1dc   : > { %v1139_v59 = vadd.f32 %v1138_v41, %v1026_v43 }
 0x1de   : > { %v1858_v0 = vadd.f32 %v3006_v53, %v1139_v59  ;;  %1431 = vmatmul.f32.gmra.mxu2 %v2315_v1  ;;  %v802_v11 = vpop.f32.mrf.mxu0  ;;  %v915_v25 = vpop.f32.mrf.mxu1  ;;  %1544 = vmatmul.f32.gmra.mxu3 %v2316_v23  ;;  %v2319_v59 = vld [vmem:[%s2806_s20 + $0x1f0] sm:$0xff] }
 0x1df   : > { %v916_v10 = vadd.f32 %v915_v25, %v802_v11  ;;  %v2320_v11 = vld [vmem:[%s2806_s20 + $0x1f8] sm:$0xff] }
 0x1e0   : > { %1922 = vst [vmem:[%s3015_s6 + $0x1d0] sm:$0xff] %v1858_v0 }
 0x1e1   : > { %v1028_v42 = vpop.f32.mrf.mxu2  ;;  %1205 = vmatmul.f32.gmra.mxu0 %v2317_v28  ;;  %1318 = vmatmul.f32.gmra.mxu1 %v2318_v54  ;;  %v1141_v16 = vpop.f32.mrf.mxu3  ;;  %v2321_v28 = vld [vmem:[%s2806_s20 + $0x1e0] sm:$0xff]  ;;  %v2322_v54 = vld [vmem:[%s2806_s20 + $0x1e8] sm:$0xff] }
 0x1e2   : > { %v1029_v46 = vadd.f32 %v1028_v42, %v916_v10 }
 0x1e4   : > { %v1142_v41 = vadd.f32 %v1141_v16, %v1029_v46 }
 0x1e6   : > { %v1860_v43 = vadd.f32 %v3006_v53, %v1142_v41  ;;  %1434 = vmatmul.f32.gmra.mxu2 %v2319_v59  ;;  %v805_v1 = vpop.f32.mrf.mxu0  ;;  %v918_v23 = vpop.f32.mrf.mxu1  ;;  %1547 = vmatmul.f32.gmra.mxu3 %v2320_v11  ;;  %v2323_v41 = vld [vmem:[%s2806_s20 + $0x210] sm:$0xff] }
 0x1e7   : > { %v919_v0 = vadd.f32 %v918_v23, %v805_v1 }
 0x1e8   : > { %1924 = vst [vmem:[%s3015_s6 + $0x1e0] sm:$0xff] %v1860_v43  ;;  %v2324_v43 = vld [vmem:[%s2806_s20 + $0x218] sm:$0xff] }
 0x1e9   : > { %v1031_v25 = vpop.f32.mrf.mxu2  ;;  %1208 = vmatmul.f32.gmra.mxu0 %v2321_v28  ;;  %1321 = vmatmul.f32.gmra.mxu1 %v2322_v54  ;;  %v1144_v10 = vpop.f32.mrf.mxu3  ;;  %v2325_v28 = vld [vmem:[%s2806_s20 + $0x200] sm:$0xff]  ;;  %v2326_v54 = vld [vmem:[%s2806_s20 + $0x208] sm:$0xff] }
 0x1ea   : > { %v1032_v42 = vadd.f32 %v1031_v25, %v919_v0  ;;  %v2327_v25 = vld [vmem:[%s266_s11] sm:$0x3] }
 0x1ec   : > { %v1145_v16 = vadd.f32 %v1144_v10, %v1032_v42  ;;  %v3382_v10 = vperm.slane %v2327_v25, 1 }
 0x1ee   : > { %v1862_v46 = vadd.f32 %v3006_v53, %v1145_v16  ;;  %1437 = vmatmul.f32.gmra.mxu2 %v2323_v41  ;;  %v1164_v59 = vpop.f32.mrf.mxu0  ;;  %v1277_v11 = vpop.f32.mrf.mxu1  ;;  %1550 = vmatmul.f32.gmra.mxu3 %v2324_v43  ;;  %v2328_v41 = vld [vmem:[%s2806_s20 + $0x230] sm:$0xff] }
 0x1ef   : > { %v1278_v1 = vadd.f32 %v1277_v11, %v1164_v59  ;;  %v2329_v11 = vld [vmem:[%s2806_s20 + $0x238] sm:$0xff] }
 0x1f0   : > { %1926 = vst [vmem:[%s3015_s6 + $0x1f0] sm:$0xff] %v1862_v46 }
 0x1f1   : > { %v1390_v23 = vpop.f32.mrf.mxu2  ;;  %1211 = vmatmul.f32.gmra.mxu0 %v2325_v28  ;;  %1324 = vmatmul.f32.gmra.mxu1 %v2326_v54  ;;  %v1503_v0 = vpop.f32.mrf.mxu3 }
 0x1f2   : > { %v1391_v53 = vadd.f32 %v1390_v23, %v1278_v1  ;;  %v2330_v1 = vld [vmem:[%s2806_s20 + $0x220] sm:$0xff]  ;;  %v2331_v23 = vld [vmem:[%s2806_s20 + $0x228] sm:$0xff] }
 0x1f4   : > { %v1504_v42 = vadd.f32 %v1503_v0, %v1391_v53 }
 0x1f6   : > { %v1801_v16 = vadd.f32 %v3382_v10, %v1504_v42  ;;  %1440 = vmatmul.f32.gmra.mxu2 %v2328_v41  ;;  %v1167_v46 = vpop.f32.mrf.mxu0  ;;  %v1280_v59 = vpop.f32.mrf.mxu1  ;;  %1553 = vmatmul.f32.gmra.mxu3 %v2329_v11  ;;  %v2332_v42 = vld [vmem:[%s2806_s20 + $0x250] sm:$0xff] }
 0x1f7   : > { %v1281_v43 = vadd.f32 %v1280_v59, %v1167_v46  ;;  %v2334_v59 = vld [vmem:[%s2806_s20 + $0x240] sm:$0xff] }
 0x1f8   : > { %1865 = vst [vmem:[%s3015_s6 + $0x8] sm:$0xff] %v1801_v16 }
 0x1f9   : > { %v1393_v28 = vpop.f32.mrf.mxu2  ;;  %1214 = vmatmul.f32.gmra.mxu0 %v2330_v1  ;;  %1327 = vmatmul.f32.gmra.mxu1 %v2331_v23  ;;  %v1506_v54 = vpop.f32.mrf.mxu3  ;;  %v2335_v1 = vld [vmem:[%s2806_s20 + $0x248] sm:$0xff]  ;;  %s2440_s20 = sshra.s32 %s1947_s12, 4  ;;  %s2441_s20 = int_to_ptr.hbm [resolvable:$true] %s2440_s20 }
 0x1fa   : > { %v1394_v0 = vadd.f32 %v1393_v28, %v1281_v43  ;;  %s2442_s0 = scalar_lea.hbm %s2441_s20, 512  ;;  %p2447_p2 = scmp.lt.s32.totalorder %s2441_s20, %s3636_s26 }
 0x1fb   : > { %p2443_p4 = scmp.ne.s32.totalorder %s2441_s20, %s2442_s0  ;;  %p2448_p1 = scmp.lt.s32.totalorder %s2446_s30, %s2442_s0 }
 0x1fc   : > { %v1507_v53 = vadd.f32 %v1506_v54, %v1394_v0 }
 0x1fd   : > { %p2444_p6 = pnand %p2443_p4, %p2775_p3  ;;  %p2449_p7 = por %p2448_p1, %p2447_p2 }
 0x1fe   : > { %v1803_v25 = vadd.f32 %v3382_v10, %v1507_v53  ;;  %1443 = vmatmul.f32.gmra.mxu2 %v2332_v42  ;;  %v1170_v41 = vpop.f32.mrf.mxu0  ;;  %v1283_v11 = vpop.f32.mrf.mxu1  ;;  %1556 = vmatmul.f32.gmra.mxu3 %v2333_v24 }
 0x1ff   : > { %v1284_v16 = vadd.f32 %v1283_v11, %v1170_v41  ;;  %p2445_p9 = pneg %p2444_p6 }
 0x200   : > { %1867 = vst [vmem:[%s3015_s6 + $0x18] sm:$0xff] %v1803_v25 }
 0x201   : > { %v1396_v46 = vpop.f32.mrf.mxu2  ;;  %1217 = vmatmul.f32.gmra.mxu0 %v2334_v59  ;;  %1330 = vmatmul.f32.gmra.mxu1 %v2335_v1  ;;  %v1509_v23 = vpop.f32.mrf.mxu3  ;;  %p2450_p8 = pnand %p2449_p7, %p2445_p9 }
 0x202   : > { %v1397_v9 = vadd.f32 %v1396_v46, %v1284_v16 }
 0x204   : > { %v1510_v43 = vadd.f32 %v1509_v23, %v1397_v9 }
 0x206   : > { %v1805_v28 = vadd.f32 %v3382_v10, %v1510_v43  ;;  %1446 = vmatmul.f32.gmra.mxu2 %v3029_v20  ;;  %v1173_v54 = vpop.f32.mrf.mxu0  ;;  %v1286_v0 = vpop.f32.mrf.mxu1  ;;  %1559 = vmatmul.f32.gmra.mxu3 %v3032_v21 }
 0x207   : > { %v1287_v24 = vadd.f32 %v1286_v0, %v1173_v54 }
 0x208   : > { %1869 = vst [vmem:[%s3015_s6 + $0x28] sm:$0xff] %v1805_v28 }
 0x209   : > { %v1399_v53 = vpop.f32.mrf.mxu2  ;;  %1220 = vmatmul.f32.gmra.mxu0 %v3038_v26  ;;  %1333 = vmatmul.f32.gmra.mxu1 %v3041_v27  ;;  %v1512_v25 = vpop.f32.mrf.mxu3 }
 0x20a   : > { %v1400_v42 = vadd.f32 %v1399_v53, %v1287_v24 }
 0x20c   : > { %v1513_v41 = vadd.f32 %v1512_v25, %v1400_v42 }
 0x20e   : > { %v1807_v9 = vadd.f32 %v3382_v10, %v1513_v41  ;;  %1449 = vmatmul.f32.gmra.mxu2 %v3047_v32  ;;  %v1176_v20 = vpop.f32.mrf.mxu0  ;;  %v1289_v11 = vpop.f32.mrf.mxu1  ;;  %1562 = vmatmul.f32.gmra.mxu3 %v3050_v33 }
 0x20f   : > { %v1290_v21 = vadd.f32 %v1289_v11, %v1176_v20 }
 0x210   : > { %1871 = vst [vmem:[%s3015_s6 + $0x38] sm:$0xff] %v1807_v9 }
 0x211   : > { %v1402_v16 = vpop.f32.mrf.mxu2  ;;  %1223 = vmatmul.f32.gmra.mxu0 %v3056_v38  ;;  %1336 = vmatmul.f32.gmra.mxu1 %v3059_v39  ;;  %v1515_v26 = vpop.f32.mrf.mxu3 }
 0x212   : > { %v1403_v27 = vadd.f32 %v1402_v16, %v1290_v21 }
 0x214   : > { %v1516_v46 = vadd.f32 %v1515_v26, %v1403_v27 }
 0x216   : > { %v1809_v59 = vadd.f32 %v3382_v10, %v1516_v46  ;;  %1452 = vmatmul.f32.gmra.mxu2 %v3069_v48  ;;  %v1179_v32 = vpop.f32.mrf.mxu0  ;;  %v1292_v1 = vpop.f32.mrf.mxu1  ;;  %1565 = vmatmul.f32.gmra.mxu3 %v3072_v49 }
 0x217   : > { %v1293_v33 = vadd.f32 %v1292_v1, %v1179_v32 }
 0x218   : > { %1873 = vst [vmem:[%s3015_s6 + $0x48] sm:$0xff] %v1809_v59 }
 0x219   : > { %v1405_v23 = vpop.f32.mrf.mxu2  ;;  %1226 = vmatmul.f32.gmra.mxu0 %v3078_v55  ;;  %1339 = vmatmul.f32.gmra.mxu1 %v3081_v56  ;;  %v1518_v38 = vpop.f32.mrf.mxu3 }
 0x21a   : > { %v1406_v39 = vadd.f32 %v1405_v23, %v1293_v33 }
 0x21c   : > { %v1519_v43 = vadd.f32 %v1518_v38, %v1406_v39 }
 0x21e   : > { %v1811_v28 = vadd.f32 %v3382_v10, %v1519_v43  ;;  %1455 = vmatmul.f32.gmra.mxu2 %v3087_v61  ;;  %v1182_v48 = vpop.f32.mrf.mxu0  ;;  %v1295_v54 = vpop.f32.mrf.mxu1  ;;  %1568 = vmatmul.f32.gmra.mxu3 %v3090_v62 }
 0x21f   : > { %v1296_v49 = vadd.f32 %v1295_v54, %v1182_v48 }
 0x220   : > { %1875 = vst [vmem:[%s3015_s6 + $0x58] sm:$0xff] %v1811_v28 }
 0x221   : > { %v1408_v0 = vpop.f32.mrf.mxu2  ;;  %1229 = vmatmul.f32.gmra.mxu0 %v3096_v3  ;;  %1342 = vmatmul.f32.gmra.mxu1 %v3099_v4  ;;  %v1521_v55 = vpop.f32.mrf.mxu3 }
 0x222   : > { %v1409_v56 = vadd.f32 %v1408_v0, %v1296_v49 }
 0x224   : > { %v1522_v24 = vadd.f32 %v1521_v55, %v1409_v56 }
 0x226   : > { %v1813_v53 = vadd.f32 %v3382_v10, %v1522_v24  ;;  %1458 = vmatmul.f32.gmra.mxu2 %v3109_v13  ;;  %v1185_v61 = vpop.f32.mrf.mxu0  ;;  %v1298_v25 = vpop.f32.mrf.mxu1  ;;  %1571 = vmatmul.f32.gmra.mxu3 %v3112_v14 }
 0x227   : > { %v1299_v62 = vadd.f32 %v1298_v25, %v1185_v61 }
 0x228   : > { %1877 = vst [vmem:[%s3015_s6 + $0x68] sm:$0xff] %v1813_v53 }
 0x229   : > { %v1411_v42 = vpop.f32.mrf.mxu2  ;;  %1232 = vmatmul.f32.gmra.mxu0 %v3118_v19  ;;  %1345 = vmatmul.f32.gmra.mxu1 %v3121_v22  ;;  %v1524_v3 = vpop.f32.mrf.mxu3 }
 0x22a   : > { %v1412_v4 = vadd.f32 %v1411_v42, %v1299_v62 }
 0x22c   : > { %v1525_v41 = vadd.f32 %v1524_v3, %v1412_v4  ;;  %v3631_v4 = vld [vmem:[#allocation26_spill] sm:$0xff] }
 0x22e   : > { %v1815_v9 = vadd.f32 %v3382_v10, %v1525_v41  ;;  %1461 = vmatmul.f32.gmra.mxu2 %v3127_v29  ;;  %v1188_v13 = vpop.f32.mrf.mxu0  ;;  %v1301_v20 = vpop.f32.mrf.mxu1  ;;  %1574 = vmatmul.f32.gmra.mxu3 %v3130_v30 }
 0x22f   : > { %v1302_v14 = vadd.f32 %v1301_v20, %v1188_v13  ;;  %v3633_v20 = vld [vmem:[#allocation28_spill] sm:$0xff] }
 0x230   : > { %1879 = vst [vmem:[%s3015_s6 + $0x78] sm:$0xff] %v1815_v9  ;;  %v3632_v9 = vld [vmem:[#allocation27_spill] sm:$0xff] }
 0x231   : > { %v1414_v11 = vpop.f32.mrf.mxu2  ;;  %1235 = vmatmul.f32.gmra.mxu0 %v3136_v37  ;;  %1348 = vmatmul.f32.gmra.mxu1 %v3139_v40  ;;  %v1527_v19 = vpop.f32.mrf.mxu3 }
 0x232   : > { %v1415_v22 = vadd.f32 %v1414_v11, %v1302_v14 }
 0x234   : > { %v1528_v21 = vadd.f32 %v1527_v19, %v1415_v22 }
 0x236   : > { %v1817_v16 = vadd.f32 %v3382_v10, %v1528_v21  ;;  %1464 = vmatmul.f32.gmra.mxu2 %v3149_v51  ;;  %v1191_v29 = vpop.f32.mrf.mxu0  ;;  %v1304_v26 = vpop.f32.mrf.mxu1  ;;  %1577 = vmatmul.f32.gmra.mxu3 %v3152_v52 }
 0x237   : > { %v1305_v30 = vadd.f32 %v1304_v26, %v1191_v29 }
 0x238   : > { %1881 = vst [vmem:[%s3015_s6 + $0x88] sm:$0xff] %v1817_v16 }
 0x239   : > { %v1417_v27 = vpop.f32.mrf.mxu2  ;;  %1238 = vmatmul.f32.gmra.mxu0 %v3158_v60  ;;  %1351 = vmatmul.f32.gmra.mxu1 %v3161_v63  ;;  %v1530_v37 = vpop.f32.mrf.mxu3 }
 0x23a   : > { %v1418_v40 = vadd.f32 %v1417_v27, %v1305_v30 }
 0x23c   : > { %v1531_v46 = vadd.f32 %v1530_v37, %v1418_v40 }
 0x23e   : > { %v1819_v59 = vadd.f32 %v3382_v10, %v1531_v46  ;;  %1467 = vmatmul.f32.gmra.mxu2 %v3167_v6  ;;  %v1194_v51 = vpop.f32.mrf.mxu0  ;;  %v1307_v32 = vpop.f32.mrf.mxu1  ;;  %1580 = vmatmul.f32.gmra.mxu3 %v3170_v7 }
 0x23f   : > { %v1308_v52 = vadd.f32 %v1307_v32, %v1194_v51 }
 0x240   : > { %1883 = vst [vmem:[%s3015_s6 + $0x98] sm:$0xff] %v1819_v59 }
 0x241   : > { %v1420_v1 = vpop.f32.mrf.mxu2  ;;  %1241 = vmatmul.f32.gmra.mxu0 %v3176_v12  ;;  %1354 = vmatmul.f32.gmra.mxu1 %v3179_v15  ;;  %v1533_v60 = vpop.f32.mrf.mxu3 }
 0x242   : > { %v1421_v63 = vadd.f32 %v1420_v1, %v1308_v52 }
 0x244   : > { %v1534_v33 = vadd.f32 %v1533_v60, %v1421_v63 }
 0x246   : > { %v1821_v23 = vadd.f32 %v3382_v10, %v1534_v33  ;;  %1470 = vmatmul.f32.gmra.mxu2 %v3189_v34  ;;  %v1197_v6 = vpop.f32.mrf.mxu0  ;;  %v1310_v38 = vpop.f32.mrf.mxu1  ;;  %1583 = vmatmul.f32.gmra.mxu3 %v3192_v35 }
 0x247   : > { %v1311_v7 = vadd.f32 %v1310_v38, %v1197_v6 }
 0x248   : > { %1885 = vst [vmem:[%s3015_s6 + $0xa8] sm:$0xff] %v1821_v23 }
 0x249   : > { %v1423_v39 = vpop.f32.mrf.mxu2  ;;  %1244 = vmatmul.f32.gmra.mxu0 %v3198_v44  ;;  %1357 = vmatmul.f32.gmra.mxu1 %v3201_v45  ;;  %v1536_v12 = vpop.f32.mrf.mxu3 }
 0x24a   : > { %v1424_v15 = vadd.f32 %v1423_v39, %v1311_v7 }
 0x24c   : > { %v1537_v43 = vadd.f32 %v1536_v12, %v1424_v15 }
 0x24e   : > { %v1823_v28 = vadd.f32 %v3382_v10, %v1537_v43  ;;  %1473 = vmatmul.f32.gmra.mxu2 %v3207_v57  ;;  %v1200_v34 = vpop.f32.mrf.mxu0  ;;  %v1313_v48 = vpop.f32.mrf.mxu1  ;;  %1586 = vmatmul.f32.gmra.mxu3 %v3210_v58 }
 0x24f   : > { %v1314_v35 = vadd.f32 %v1313_v48, %v1200_v34 }
 0x250   : > { %1887 = vst [vmem:[%s3015_s6 + $0xb8] sm:$0xff] %v1823_v28 }
 0x251   : > { %v1426_v54 = vpop.f32.mrf.mxu2  ;;  %1247 = vmatmul.f32.gmra.mxu0 %v3216_v5  ;;  %1360 = vmatmul.f32.gmra.mxu1 %v3219_v8  ;;  %v1539_v44 = vpop.f32.mrf.mxu3 }
 0x252   : > { %v1427_v45 = vadd.f32 %v1426_v54, %v1314_v35 }
 0x254   : > { %v1540_v49 = vadd.f32 %v1539_v44, %v1427_v45 }
 0x256   : > { %v1825_v0 = vadd.f32 %v3382_v10, %v1540_v49  ;;  %1476 = vmatmul.f32.gmra.mxu2 %v3225_v17  ;;  %v1203_v57 = vpop.f32.mrf.mxu0  ;;  %v1316_v55 = vpop.f32.mrf.mxu1  ;;  %1589 = vmatmul.f32.gmra.mxu3 %v3228_v18 }
 0x257   : > { %v1317_v58 = vadd.f32 %v1316_v55, %v1203_v57 }
 0x258   : > { %1889 = vst [vmem:[%s3015_s6 + $0xc8] sm:$0xff] %v1825_v0 }
 0x259   : > { %v1429_v56 = vpop.f32.mrf.mxu2  ;;  %1250 = vmatmul.f32.gmra.mxu0 %v3234_v31  ;;  %1363 = vmatmul.f32.gmra.mxu1 %v3237_v36  ;;  %v1542_v5 = vpop.f32.mrf.mxu3  ;;  %v3630_v31 = vld [vmem:[#allocation25_spill] sm:$0xff] }
 0x25a   : > { %v1430_v8 = vadd.f32 %v1429_v56, %v1317_v58 }
 0x25c   : > { %v1543_v24 = vadd.f32 %v1542_v5, %v1430_v8 }
 0x25e   : > { %v1827_v53 = vadd.f32 %v3382_v10, %v1543_v24  ;;  %1479 = vmatmul.f32.gmra.mxu2 %v3243_v47  ;;  %v1206_v17 = vpop.f32.mrf.mxu0  ;;  %v1319_v61 = vpop.f32.mrf.mxu1  ;;  %1592 = vmatmul.f32.gmra.mxu3 %v3246_v50 }
 0x25f   : > { %v1320_v18 = vadd.f32 %v1319_v61, %v1206_v17 }
 0x260   : > { %1891 = vst [vmem:[%s3015_s6 + $0xd8] sm:$0xff] %v1827_v53 }
 0x261   : > { %v1432_v25 = vpop.f32.mrf.mxu2  ;;  %1253 = vmatmul.f32.gmra.mxu0 %v3252_v2  ;;  %1366 = vmatmul.f32.gmra.mxu1 %v3630_v31  ;;  %v1545_v36 = vpop.f32.mrf.mxu3  ;;  %v3634_v2 = vld [vmem:[#allocation29_spill] sm:$0xff] }
 0x262   : > { %v1433_v62 = vadd.f32 %v1432_v25, %v1320_v18 }
 0x264   : > { %v1546_v42 = vadd.f32 %v1545_v36, %v1433_v62 }
 0x266   : > { %v1829_v3 = vadd.f32 %v3382_v10, %v1546_v42  ;;  %1482 = vmatmul.f32.gmra.mxu2 %v3631_v4  ;;  %v1209_v47 = vpop.f32.mrf.mxu0  ;;  %v1322_v41 = vpop.f32.mrf.mxu1  ;;  %1595 = vmatmul.f32.gmra.mxu3 %v3632_v9 }
 0x267   : > { %v1323_v50 = vadd.f32 %v1322_v41, %v1209_v47 }
 0x268   : > { %1893 = vst [vmem:[%s3015_s6 + $0xe8] sm:$0xff] %v1829_v3 }
 0x269   : > { %v1435_v13 = vpop.f32.mrf.mxu2  ;;  %1256 = vmatmul.f32.gmra.mxu0 %v3633_v20  ;;  %1369 = vmatmul.f32.gmra.mxu1 %v3634_v2  ;;  %v1548_v14 = vpop.f32.mrf.mxu3 }
 0x26a   : > { %v1436_v11 = vadd.f32 %v1435_v13, %v1323_v50 }
 0x26c   : > { %v1549_v19 = vadd.f32 %v1548_v14, %v1436_v11 }
 0x26e   : > { %v1831_v22 = vadd.f32 %v3382_v10, %v1549_v19  ;;  %v1212_v21 = vpop.f32.mrf.mxu0  ;;  %v1325_v16 = vpop.f32.mrf.mxu1 }
 0x26f   : > { %v1326_v29 = vadd.f32 %v1325_v16, %v1212_v21 }
 0x270   : > { %1895 = vst [vmem:[%s3015_s6 + $0xf8] sm:$0xff] %v1831_v22 }
 0x271   : > { %v1438_v26 = vpop.f32.mrf.mxu2  ;;  %v1551_v30 = vpop.f32.mrf.mxu3 }
 0x272   : > { %v1439_v27 = vadd.f32 %v1438_v26, %v1326_v29 }
 0x274   : > { %v1552_v37 = vadd.f32 %v1551_v30, %v1439_v27 }
 0x276   : > { %v1833_v40 = vadd.f32 %v3382_v10, %v1552_v37  ;;  %v1215_v46 = vpop.f32.mrf.mxu0  ;;  %v1328_v59 = vpop.f32.mrf.mxu1 }
 0x277   : > { %v1329_v51 = vadd.f32 %v1328_v59, %v1215_v46 }
 0x278   : > { %1897 = vst [vmem:[%s3015_s6 + $0x108] sm:$0xff] %v1833_v40 }
 0x279   : > { %v1441_v32 = vpop.f32.mrf.mxu2  ;;  %v1554_v52 = vpop.f32.mrf.mxu3 }
 0x27a   : > { %v1442_v1 = vadd.f32 %v1441_v32, %v1329_v51 }
 0x27c   : > { %v1555_v60 = vadd.f32 %v1554_v52, %v1442_v1 }
 0x27e   : > { %v1835_v63 = vadd.f32 %v3382_v10, %v1555_v60  ;;  %v1218_v33 = vpop.f32.mrf.mxu0  ;;  %v1331_v23 = vpop.f32.mrf.mxu1 }
 0x27f   : > { %v1332_v6 = vadd.f32 %v1331_v23, %v1218_v33 }
 0x280   : > { %1899 = vst [vmem:[%s3015_s6 + $0x118] sm:$0xff] %v1835_v63 }
 0x281   : > { %v1444_v38 = vpop.f32.mrf.mxu2  ;;  %v1557_v7 = vpop.f32.mrf.mxu3 }
 0x282   : > { %v1445_v39 = vadd.f32 %v1444_v38, %v1332_v6 }
 0x284   : > { %v1558_v12 = vadd.f32 %v1557_v7, %v1445_v39 }
 0x286   : > { %v1837_v15 = vadd.f32 %v3382_v10, %v1558_v12  ;;  %v1221_v43 = vpop.f32.mrf.mxu0  ;;  %v1334_v28 = vpop.f32.mrf.mxu1 }
 0x287   : > { %v1335_v34 = vadd.f32 %v1334_v28, %v1221_v43 }
 0x288   : > { %1901 = vst [vmem:[%s3015_s6 + $0x128] sm:$0xff] %v1837_v15 }
 0x289   : > { %v1447_v48 = vpop.f32.mrf.mxu2  ;;  %v1560_v35 = vpop.f32.mrf.mxu3 }
 0x28a   : > { %v1448_v54 = vadd.f32 %v1447_v48, %v1335_v34 }
 0x28c   : > { %v1561_v44 = vadd.f32 %v1560_v35, %v1448_v54 }
 0x28e   : > { %v1839_v45 = vadd.f32 %v3382_v10, %v1561_v44  ;;  %v1224_v49 = vpop.f32.mrf.mxu0  ;;  %v1337_v0 = vpop.f32.mrf.mxu1 }
 0x28f   : > { %v1338_v57 = vadd.f32 %v1337_v0, %v1224_v49 }
 0x290   : > { %1903 = vst [vmem:[%s3015_s6 + $0x138] sm:$0xff] %v1839_v45 }
 0x291   : > { %v1450_v55 = vpop.f32.mrf.mxu2  ;;  %v1563_v58 = vpop.f32.mrf.mxu3 }
 0x292   : > { %v1451_v56 = vadd.f32 %v1450_v55, %v1338_v57 }
 0x294   : > { %v1564_v5 = vadd.f32 %v1563_v58, %v1451_v56 }
 0x296   : > { %v1841_v8 = vadd.f32 %v3382_v10, %v1564_v5  ;;  %v1227_v24 = vpop.f32.mrf.mxu0  ;;  %v1340_v53 = vpop.f32.mrf.mxu1 }
 0x297   : > { %v1341_v17 = vadd.f32 %v1340_v53, %v1227_v24 }
 0x298   : > { %1905 = vst [vmem:[%s3015_s6 + $0x148] sm:$0xff] %v1841_v8 }
 0x299   : > { %v1453_v61 = vpop.f32.mrf.mxu2  ;;  %v1566_v18 = vpop.f32.mrf.mxu3 }
 0x29a   : > { %v1454_v25 = vadd.f32 %v1453_v61, %v1341_v17 }
 0x29c   : > { %v1567_v31 = vadd.f32 %v1566_v18, %v1454_v25 }
 0x29e   : > { %v1843_v36 = vadd.f32 %v3382_v10, %v1567_v31  ;;  %v1230_v62 = vpop.f32.mrf.mxu0  ;;  %v1343_v42 = vpop.f32.mrf.mxu1 }
 0x29f   : > { %v1344_v3 = vadd.f32 %v1343_v42, %v1230_v62 }
 0x2a0   : > { %1907 = vst [vmem:[%s3015_s6 + $0x158] sm:$0xff] %v1843_v36 }
 0x2a1   : > { %v1456_v4 = vpop.f32.mrf.mxu2  ;;  %v1569_v47 = vpop.f32.mrf.mxu3 }
 0x2a2   : > { %v1457_v41 = vadd.f32 %v1456_v4, %v1344_v3 }
 0x2a4   : > { %v1570_v9 = vadd.f32 %v1569_v47, %v1457_v41 }
 0x2a6   : > { %v1845_v50 = vadd.f32 %v3382_v10, %v1570_v9  ;;  %v1233_v13 = vpop.f32.mrf.mxu0  ;;  %v1346_v20 = vpop.f32.mrf.mxu1 }
 0x2a7   : > { %v1347_v2 = vadd.f32 %v1346_v20, %v1233_v13 }
 0x2a8   : > { %1909 = vst [vmem:[%s3015_s6 + $0x168] sm:$0xff] %v1845_v50 }
 0x2a9   : > { %v1459_v14 = vpop.f32.mrf.mxu2  ;;  %v1572_v11 = vpop.f32.mrf.mxu3 }
 0x2aa   : > { %v1460_v19 = vadd.f32 %v1459_v14, %v1347_v2 }
 0x2ac   : > { %v1573_v22 = vadd.f32 %v1572_v11, %v1460_v19 }
 0x2ae   : > { %v1847_v21 = vadd.f32 %v3382_v10, %v1573_v22  ;;  %v1236_v16 = vpop.f32.mrf.mxu0  ;;  %v1349_v29 = vpop.f32.mrf.mxu1 }
 0x2af   : > { %v1350_v26 = vadd.f32 %v1349_v29, %v1236_v16 }
 0x2b0   : > { %1911 = vst [vmem:[%s3015_s6 + $0x178] sm:$0xff] %v1847_v21 }
 0x2b1   : > { %v1462_v30 = vpop.f32.mrf.mxu2  ;;  %v1575_v27 = vpop.f32.mrf.mxu3 }
 0x2b2   : > { %v1463_v37 = vadd.f32 %v1462_v30, %v1350_v26 }
 0x2b4   : > { %v1576_v40 = vadd.f32 %v1575_v27, %v1463_v37 }
 0x2b6   : > { %v1849_v46 = vadd.f32 %v3382_v10, %v1576_v40  ;;  %v1239_v59 = vpop.f32.mrf.mxu0  ;;  %v1352_v51 = vpop.f32.mrf.mxu1 }
 0x2b7   : > { %v1353_v32 = vadd.f32 %v1352_v51, %v1239_v59 }
 0x2b8   : > { %1913 = vst [vmem:[%s3015_s6 + $0x188] sm:$0xff] %v1849_v46 }
 0x2b9   : > { %v1465_v52 = vpop.f32.mrf.mxu2  ;;  %v1578_v1 = vpop.f32.mrf.mxu3 }
 0x2ba   : > { %v1466_v60 = vadd.f32 %v1465_v52, %v1353_v32 }
 0x2bc   : > { %v1579_v63 = vadd.f32 %v1578_v1, %v1466_v60 }
 0x2be   : > { %v1851_v33 = vadd.f32 %v3382_v10, %v1579_v63  ;;  %v1242_v23 = vpop.f32.mrf.mxu0  ;;  %v1355_v6 = vpop.f32.mrf.mxu1 }
 0x2bf   : > { %v1356_v38 = vadd.f32 %v1355_v6, %v1242_v23 }
 0x2c0   : > { %1915 = vst [vmem:[%s3015_s6 + $0x198] sm:$0xff] %v1851_v33 }
 0x2c1   : > { %v1468_v7 = vpop.f32.mrf.mxu2  ;;  %v1581_v39 = vpop.f32.mrf.mxu3 }
 0x2c2   : > { %v1469_v12 = vadd.f32 %v1468_v7, %v1356_v38 }
 0x2c4   : > { %v1582_v15 = vadd.f32 %v1581_v39, %v1469_v12 }
 0x2c6   : > { %v1853_v43 = vadd.f32 %v3382_v10, %v1582_v15  ;;  %v1245_v28 = vpop.f32.mrf.mxu0  ;;  %v1358_v34 = vpop.f32.mrf.mxu1 }
 0x2c7   : > { %v1359_v48 = vadd.f32 %v1358_v34, %v1245_v28 }
 0x2c8   : > { %1917 = vst [vmem:[%s3015_s6 + $0x1a8] sm:$0xff] %v1853_v43 }
 0x2c9   : > { %v1471_v35 = vpop.f32.mrf.mxu2  ;;  %v1584_v54 = vpop.f32.mrf.mxu3 }
 0x2ca   : > { %v1472_v44 = vadd.f32 %v1471_v35, %v1359_v48 }
 0x2cc   : > { %v1585_v45 = vadd.f32 %v1584_v54, %v1472_v44 }
 0x2ce   : > { %v1855_v49 = vadd.f32 %v3382_v10, %v1585_v45  ;;  %v1248_v0 = vpop.f32.mrf.mxu0  ;;  %v1361_v57 = vpop.f32.mrf.mxu1 }
 0x2cf   : > { %v1362_v55 = vadd.f32 %v1361_v57, %v1248_v0 }
 0x2d0   : > { %1919 = vst [vmem:[%s3015_s6 + $0x1b8] sm:$0xff] %v1855_v49 }
 0x2d1   : > { %v1474_v58 = vpop.f32.mrf.mxu2  ;;  %v1587_v56 = vpop.f32.mrf.mxu3 }
 0x2d2   : > { %v1475_v5 = vadd.f32 %v1474_v58, %v1362_v55 }
 0x2d4   : > { %v1588_v8 = vadd.f32 %v1587_v56, %v1475_v5 }
 0x2d6   : > { %v1857_v24 = vadd.f32 %v3382_v10, %v1588_v8  ;;  %v1251_v53 = vpop.f32.mrf.mxu0  ;;  %v1364_v17 = vpop.f32.mrf.mxu1 }
 0x2d7   : > { %v1365_v61 = vadd.f32 %v1364_v17, %v1251_v53 }
 0x2d8   : > { %1921 = vst [vmem:[%s3015_s6 + $0x1c8] sm:$0xff] %v1857_v24 }
 0x2d9   : > { %v1477_v18 = vpop.f32.mrf.mxu2  ;;  %v1590_v25 = vpop.f32.mrf.mxu3 }
 0x2da   : > { %v1478_v31 = vadd.f32 %v1477_v18, %v1365_v61 }
 0x2dc   : > { %v1591_v36 = vadd.f32 %v1590_v25, %v1478_v31 }
 0x2de   : > { %v1859_v62 = vadd.f32 %v3382_v10, %v1591_v36  ;;  %v1254_v42 = vpop.f32.mrf.mxu0  ;;  %v1367_v3 = vpop.f32.mrf.mxu1 }
 0x2df   : > { %v1368_v4 = vadd.f32 %v1367_v3, %v1254_v42 }
 0x2e0   : > { %1923 = vst [vmem:[%s3015_s6 + $0x1d8] sm:$0xff] %v1859_v62 }
 0x2e1   : > { %v1480_v47 = vpop.f32.mrf.mxu2  ;;  %v1593_v41 = vpop.f32.mrf.mxu3 }
 0x2e2   : > { %v1481_v9 = vadd.f32 %v1480_v47, %v1368_v4 }
 0x2e4   : > { %v1594_v50 = vadd.f32 %v1593_v41, %v1481_v9 }
 0x2e6   : > { %v1861_v13 = vadd.f32 %v3382_v10, %v1594_v50  ;;  %v1257_v20 = vpop.f32.mrf.mxu0  ;;  %v1370_v2 = vpop.f32.mrf.mxu1 }
 0x2e7   : > { %v1371_v14 = vadd.f32 %v1370_v2, %v1257_v20 }
 0x2e8   : > { %1925 = vst [vmem:[%s3015_s6 + $0x1e8] sm:$0xff] %v1861_v13 }
 0x2e9   : > { %v1483_v11 = vpop.f32.mrf.mxu2  ;;  %v1596_v19 = vpop.f32.mrf.mxu3 }
 0x2ea   : > { %v1484_v22 = vadd.f32 %v1483_v11, %v1371_v14 }
 0x2ec   : > { %v1597_v21 = vadd.f32 %v1596_v19, %v1484_v22 }
 0x2ee   : > { %v1863_v16 = vadd.f32 %v3382_v10, %v1597_v21 }
 0x2f0   : > { %1927 = vst [vmem:[%s3015_s6 + $0x1f8] sm:$0xff] %v1863_v16 }
 0x2f1   : > { %2453 = shalt.err (!%p2450_p8)
}
 0x2f2   : > { %s2583_s10 = smov 256   ;;  %s2584_s11 = smov 1536  }
 0x2f3   : > { %s2585_s27 = smov 16  }
 0x2f4   : > { %2121 = dma.vmem_to_hbm [thread:$0]  (%p2775_p3), %s1945_s3, 8192, %s1947_s12, %s1929_s14, %s2583_s10, %s2584_s11, %s2585_s27  }
 0x2f5 PF: > { %s3638_s6 = sld [smem:[#allocation13_spill]]  ;;  %p2138_p10 = scmp.ge.s32.totalorder %s2576_s25, 2 }
 0x2f7   : > { %p2134_p11 = pnand %p2138_p10, %p2782_p5 }
 0x2f9   : > { %p2135_p12 = pneg %p2134_p11 }
 0x2fb   : > { %s1961_s4 = sand.u32 1, %s3638_s6  }
 0x2fc   : > { %s1962_s9 = scalar_lea.sflag [#allocation5], %s1961_s4 }
 0x2fd   : > { %2519 = dma.done.wait (%p2135_p12), %s1962_s9, 8192  }
 0x2fe   : > { %2521 = vsyncadd (%p2135_p12), %s1962_s9, 4294959104  ;;  %s22_s25 = sadd.s32 1, %s2576_s25   ;;  %s3641_s1 = sld [smem:[#allocation14_spill]] }
 0x2ff   : > { %p3531_p13 = scmp.ge.s32.totalorder %s22_s25, 14   ;;  %s3642_s14 = sld [smem:[#allocation22_spill]] }
 0x300   : > { %s3643_s22 = sld [smem:[#allocation20_spill]]  ;;  %s3649_s12 = smov %s2528_s13 }
 0x301   : > { %s3644_s7 = sld [smem:[#allocation15_spill]]  ;;  %s3651_s15 = smov %s2540_s16 }
 0x302   : > { %s3645_s20 = sld [smem:[#allocation21_spill]]  ;;  %s3652_s16 = smov %s2544_s17 }
 0x303   : > { %s3646_s3 = sld [smem:[#allocation17_spill]]  ;;  %s3654_s18 = smov %s2552_s19 }
 0x304   : > { %s3647_s0 = sld [smem:[#allocation18_spill]]  ;;  %s3650_s13 = smov %s3641_s1 }
 0x305   : > { %s3648_s24 = sld [smem:[#allocation19_spill]]  ;;  %s3656_s21 = smov %s2568_s23 }
 0x306   : > { %s3653_s17 = smov %s3643_s22  ;;  %21 = sbr.rel (!%p3531_p13) target bundleno = 16 (0x10), region = 109 }
 0x307   : > { %s3655_s19 = smov %s3644_s7 }
 0x309   : > { %s3657_s22 = smov %s3646_s3 }
 0x30a   : > { %s3658_s23 = smov %s3647_s0 }
 0x30b   :  { %1968 = vsyncpa [#allocation4], 1 }
 0x30c   :  { %1970 = vsyncpa [#allocation4 + $0x1], 1 }
 0x30d   :  { %1971 = vsyncpa [#allocation7], 1 }
 0x30e   :  { %1973 = vsyncpa [#allocation7 + $0x1], 1 }
 0x30f   :  { %1974 = vsyncpa [#allocation5], 1 }
 0x310   :  { %1976 = vsyncpa [#allocation5 + $0x1], 1 }

</bundles_post_ra>
